<compile_context>
chip_gen: v7x
topology: tpu7x:2x2x1
jax: 0.10.0
libtpu: 0.0.40
codegen_flags: <defaults>
</compile_context>

<pallas_src>
import functools
import math

import jax
import jax.numpy as jnp
from jax import lax
from jax.experimental import pallas as pl
from jax.experimental.pallas import tpu as pltpu


def _round_up(x, m):
    return ((x + m - 1) // m) * m


# ----------------------------------------------------------------------------
# Kernel
# ----------------------------------------------------------------------------
def _quantum_attention_kernel(
    x_ref,        # (Bt, S, D)          hidden states for this tile
    w_qkv_ref,    # (D, 2*HQP + D)      fused [wq_pad | wk_pad | wv], compute dtype
    b_qkv_ref,    # (1, 2*HQP + D)      fused biases, f32
    sum_ref,      # (HQP, Hc)           col -> head one-hot (per-head sum), f32
    bcast_ref,    # (Hc, HQP)           head -> its cols (broadcast back), f32
    wo_ref,       # (D, D)              compute dtype
    bo_ref,       # (1, D)              f32
    o_ref,        # (Bt, S, D)
    q_scr,        # (Bt, H, S, Dq)      VMEM scratch, compute dtype
    k_scr,        # (Bt, H, S, Dq)
    v_scr,        # (Bt, H, S, Dh)
    ctx_scr,      # (Bt, H, S, Dh)
    *,
    num_heads: int,
    quantum_dim: int,
    head_dim: int,
    seq_len: int,
    b_tile: int,
    hq: int,
    hqp: int,
    compute_dtype,
):
    H, Dq, Dh, S, Bt = num_heads, quantum_dim, head_dim, seq_len, b_tile
    D = H * Dh
    HQ, HQP = hq, hqp
    cd = compute_dtype
    rows = Bt * S

    # ---- fused QKV projection: one MXU pass over all Bt*S rows --------------
    x = x_ref[...].reshape(rows, D).astype(cd)
    qkv = jnp.dot(x, w_qkv_ref[...],
                  preferred_element_type=jnp.float32) + b_qkv_ref[...]

    # Lane-aligned slices (HQP is a multiple of 128): free views, no relayout.
    q = qkv[:, :HQP]            # (rows, HQP) f32, padded cols are exactly 0
    k = qkv[:, HQP:2 * HQP]     # (rows, HQP) f32
    v = qkv[:, 2 * HQP:]        # (rows, D)   f32

    # ---- quantum_state_preparation: per-head L2 norm, lane-dense, on MXU ----
    # Two-stage: per-head sum-of-squares (HQP->Hc) then broadcast back
    # (Hc->HQP).  ~Dq/2x cheaper than an HQPxHQP block-diagonal matmul.
    def _l2_normalize(t):
        ss = jnp.dot(t * t, sum_ref[...], preferred_element_type=jnp.float32)
        ssb = jnp.dot(ss, bcast_ref[...], preferred_element_type=jnp.float32)
        return t * lax.rsqrt(ssb + 1e-12)

    q = _l2_normalize(q)
    k = _l2_normalize(k)

    # ---- stage head-major layouts ONCE per grid step into VMEM scratch ------
    # (single lane-splitting relayout per step instead of one per batch elem).
    q_scr[...] = q[:, :HQ].reshape(Bt, S, H, Dq).transpose(0, 2, 1, 3).astype(cd)
    k_scr[...] = k[:, :HQ].reshape(Bt, S, H, Dq).transpose(0, 2, 1, 3).astype(cd)
    v_scr[...] = v.reshape(Bt, S, H, Dh).transpose(0, 2, 1, 3).astype(cd)

    scale = 1.0 / math.sqrt(float(Dq))

    # ---- per-batch-element attention: fori_loop bounds the live range -------
    # Only one (H,S,S) scores/probs tensor is live at a time.
    def _attend(b, carry):
        qb = q_scr[b]                                   # (H, S, Dq)
        kb = k_scr[b]                                   # (H, S, Dq)
        vb = v_scr[b]                                   # (H, S, Dh)
        s = jnp.einsum("hsd,htd->hst", qb, kb,
                       preferred_element_type=jnp.float32) * scale   # (H,S,S)
        m = jnp.max(s, axis=-1, keepdims=True)
        p = jnp.exp(s - m)
        l = jnp.sum(p, axis=-1, keepdims=True)
        probs = p * pl.reciprocal(l, approx=False)      # exact (tolerance-safe)
        ctx = jnp.einsum("hst,htd->hsd", probs.astype(cd), vb,
                         preferred_element_type=jnp.float32)          # (H,S,Dh)
        ctx_scr[b] = ctx.astype(cd)
        return carry

    lax.fori_loop(0, Bt, _attend, 0)

    # ---- output projection: one lane-merge relayout + one big matmul --------
    ctx = ctx_scr[...].transpose(0, 2, 1, 3).reshape(rows, D)
    out = jnp.dot(ctx.astype(cd), wo_ref[...],
                  preferred_element_type=jnp.float32) + bo_ref[...]
    o_ref[...] = out.reshape(Bt, S, D).astype(o_ref.dtype)


# ----------------------------------------------------------------------------
# Parameter preparation (done once, outside the per-call path)
# ----------------------------------------------------------------------------
def prepare_params(params, *, num_heads, quantum_dim, compute_dtype=jnp.float32):
    """Fuse, lane-align-pad and cast weights once; build norm matrices."""
    D = params["wo"].shape[0]
    head_dim = D // num_heads
    HQ = num_heads * quantum_dim
    HQP = _round_up(HQ, 128)          # lane-aligned q/k column blocks
    Hc = _round_up(num_heads, 128)    # lane-dense per-head-sum width

    def _pad_cols(w, b, width):
        pad = width - w.shape[1]
        if pad:
            w = jnp.pad(w, ((0, 0), (0, pad)))
            b = jnp.pad(b, ((0, 0), (0, pad)))
        return w, b

    wq, bq = _pad_cols(params["wq"], params["bq"], HQP)
    wk, bk = _pad_cols(params["wk"], params["bk"], HQP)
    w_qkv = jnp.concatenate([wq, wk, params["wv"]], axis=1).astype(compute_dtype)
    b_qkv = jnp.concatenate([bq, bk, params["bv"]], axis=1).astype(jnp.float32)

    # col -> head one-hot (padded cols map to an unused slot; their values are 0)
    col = jnp.arange(HQP)
    head_of_col = jnp.where(col < HQ, col // quantum_dim, num_heads)
    sum_mat = (head_of_col[:, None] == jnp.arange(Hc)[None, :]).astype(jnp.float32)
    bcast_mat = jnp.transpose(sum_mat)

    return {
        "w_qkv": w_qkv,
        "b_qkv": b_qkv,
        "sum_mat": sum_mat,
        "bcast_mat": bcast_mat,
        "wo": params["wo"].astype(compute_dtype),
        "bo": params["bo"].astype(jnp.float32),
        "config": dict(num_heads=num_heads, quantum_dim=quantum_dim,
                       head_dim=head_dim, hq=HQ, hqp=HQP, hc=Hc,
                       compute_dtype=compute_dtype),
    }


# ----------------------------------------------------------------------------
# VMEM footprint model + wrapper
# ----------------------------------------------------------------------------
def _tile_vmem_bytes(bt, S, D, H, Dq, Dh, HQP, Hc, cd_bytes):
    rows = bt * S
    io = 2 * (bt * S * D * 4) * 2                       # x + out blocks, 2 buffers each
    weights = (D * (2 * HQP + D) + D * D) * cd_bytes    # fused qkv + wo (single-buffered)
    weights += ((2 * HQP + D) + D) * 4                  # biases (f32)
    weights += 2 * HQP * Hc * 4                         # norm matrices (f32)
    scratch = rows * 2 * (H * Dq + H * Dh) * cd_bytes   # q/k/v/ctx head-major scratch
    live = rows * (2 * HQP + D) * 4                     # qkv projection result (f32)
    live += 3 * H * S * S * 4                           # scores/exp/probs of ONE batch elem
    return io + weights + scratch + live + (2 << 20)    # + compiler slack


def quantum_attention(hidden_states, prepared, *, b_tile=None):
    cfg = prepared["config"]
    H, Dq, Dh = cfg["num_heads"], cfg["quantum_dim"], cfg["head_dim"]
    HQ, HQP, Hc = cfg["hq"], cfg["hqp"], cfg["hc"]
    cd = cfg["compute_dtype"]
    cd_bytes = jnp.dtype(cd).itemsize

    B, S, D = hidden_states.shape
    assert D == H * Dh

    # --- per-generation VMEM budget (v7x: 64 MiB/TC; v5e/v6e: 128 MiB) -------
    try:
        vmem_cap = int(pltpu.get_tpu_info().vmem_capacity_bytes)
    except Exception:
        vmem_cap = 64 << 20                              # conservative fallback
    target_rows = 512 if vmem_cap >= (96 << 20) else 256  # 256-aligned MXU M target
    budget = int(0.6 * vmem_cap)

    if b_tile is None:
        cands = [d for d in range(1, B + 1) if B % d == 0]
        if B >= 2:
            # keep >= 2 grid steps so both v7x TensorCores get work
            cands = [d for d in cands if d <= B // 2] or [1]
        b_tile = 1
        for d in cands:
            if (d * S <= target_rows
                    and _tile_vmem_bytes(d, S, D, H, Dq, Dh, HQP, Hc, cd_bytes) <= budget):
                b_tile = max(b_tile, d)
    assert B % b_tile == 0
    grid = (B // b_tile,)

    footprint = _tile_vmem_bytes(b_tile, S, D, H, Dq, Dh, HQP, Hc, cd_bytes)
    vmem_limit = int(min(vmem_cap, max(footprint + (16 << 20), 32 << 20)))
    # TODO(synk): when H*S*S*4 exceeds the budget (long S), add a flash-style
    # KV grid axis with online softmax instead of shrinking b_tile.

    kernel = functools.partial(
        _quantum_attention_kernel,
        num_heads=H, quantum_dim=Dq, head_dim=Dh, seq_len=S, b_tile=b_tile,
        hq=HQ, hqp=HQP, compute_dtype=cd)

    w_qkv, b_qkv = prepared["w_qkv"], prepared["b_qkv"]
    sum_mat, bcast_mat = prepared["sum_mat"], prepared["bcast_mat"]
    wo, bo = prepared["wo"], prepared["bo"]

    # Advisory cost estimate for the XLA scheduler.
    flops = (2 * B * S * D * (2 * HQP + D)              # fused QKV projection
             + 8 * B * S * HQP * Hc                     # two-stage q/k norms
             + 2 * B * H * S * S * (Dq + Dh)            # attention (tiny-K GEMMs)
             + 2 * B * S * D * D)                       # output projection
    transcendentals = B * H * S * S + B * H * S + 2 * B * S * HQP
    bytes_accessed = (2 * B * S * D * 4
                      + (w_qkv.size + wo.size) * cd_bytes
                      + (b_qkv.size + bo.size + sum_mat.size + bcast_mat.size) * 4)

    def _launch(single_buffer_weights):
        def _const_spec(shape):
            idx = (lambda b, _n=len(shape): (0,) * _n)
            if single_buffer_weights:
                # grid-invariant -> single-buffered (no pointless double-buffer)
                return pl.BlockSpec(shape, idx, pipeline_mode=pl.Buffered(1))
            return pl.BlockSpec(shape, idx)

        grid_spec = pltpu.PrefetchScalarGridSpec(
            num_scalar_prefetch=0,
            grid=grid,
            in_specs=[
                pl.BlockSpec((b_tile, S, D), lambda b: (b, 0, 0)),
                _const_spec(w_qkv.shape),
                _const_spec(b_qkv.shape),
                _const_spec(sum_mat.shape),
                _const_spec(bcast_mat.shape),
                _const_spec(wo.shape),
                _const_spec(bo.shape),
            ],
            out_specs=pl.BlockSpec((b_tile, S, D), lambda b: (b, 0, 0)),
            scratch_shapes=[
                pltpu.VMEM((b_tile, H, S, Dq), cd),
                pltpu.VMEM((b_tile, H, S, Dq), cd),
                pltpu.VMEM((b_tile, H, S, Dh), cd),
                pltpu.VMEM((b_tile, H, S, Dh), cd),
            ],
        )
        return pl.pallas_call(
            kernel,
            out_shape=jax.ShapeDtypeStruct((B, S, D), hidden_states.dtype),
            grid_spec=grid_spec,
            compiler_params=pltpu.CompilerParams(
                dimension_semantics=("parallel",),
                vmem_limit_bytes=vmem_limit),
            cost_estimate=pl.CostEstimate(
                flops=int(flops), transcendentals=int(transcendentals),
                bytes_accessed=int(bytes_accessed)),
        )(hidden_states, w_qkv, b_qkv, sum_mat, bcast_mat, wo, bo)

    try:
        return _launch(True)
    except Exception:
        # Pallas versions without pipeline_mode / Buffered(1): default buffering.
        return _launch(False)


# ----------------------------------------------------------------------------
# Parameters, pure-JAX reference, and test
# ----------------------------------------------------------------------------
def init_params(key, hidden_dim, num_heads, quantum_dim):
    """Deterministic parameter init (weights [in, out]; biases stored (1, N))."""
    ks = jax.random.split(key, 8)
    hq = quantum_dim * num_heads
    s = 0.02
    return {
        "wq": s * jax.random.normal(ks[0], (hidden_dim, hq), jnp.float32),
        "bq": s * jax.random.normal(ks[1], (1, hq), jnp.float32),
        "wk": s * jax.random.normal(ks[2], (hidden_dim, hq), jnp.float32),
        "bk": s * jax.random.normal(ks[3], (1, hq), jnp.float32),
        "wv": s * jax.random.normal(ks[4], (hidden_dim, hidden_dim), jnp.float32),
        "bv": s * jax.random.normal(ks[5], (1, hidden_dim), jnp.float32),
        "wo": s * jax.random.normal(ks[6], (hidden_dim, hidden_dim), jnp.float32),
        "bo": s * jax.random.normal(ks[7], (1, hidden_dim), jnp.float32),
    }


def quantum_attention_reference(x, params, *, num_heads, quantum_dim):
    """Pure-JAX reference mirroring the PyTorch forward (eval mode, no mask)."""
    B, S, D = x.shape
    head_dim = D // num_heads
    q = (x @ params["wq"] + params["bq"]).reshape(B, S, num_heads, quantum_dim)
    k = (x @ params["wk"] + params["bk"]).reshape(B, S, num_heads, quantum_dim)
    v = (x @ params["wv"] + params["bv"]).reshape(B, S, num_heads, head_dim)
    q = q / jnp.sqrt(jnp.sum(q * q, -1, keepdims=True) + 1e-12)
    k = k / jnp.sqrt(jnp.sum(k * k, -1, keepdims=True) + 1e-12)
    scores = jnp.einsum("bshd,bthd->bhst", q, k) / jnp.sqrt(jnp.float32(quantum_dim))
    probs = jax.nn.softmax(scores, axis=-1)
    ctx = jnp.einsum("bhst,bthd->bshd", probs, v).reshape(B, S, D)
    return ctx @ params["wo"] + params["bo"]


if __name__ == "__main__":
    B, S = 2, 8
    hidden_dim, num_heads, quantum_dim = 32, 4, 8

    key = jax.random.PRNGKey(0)
    kx, kp = jax.random.split(key)
    x = jax.random.normal(kx, (B, S, hidden_dim), jnp.float32)
    params = init_params(kp, hidden_dim, num_heads, quantum_dim)

    ref = quantum_attention_reference(
        x, params, num_heads=num_heads, quantum_dim=quantum_dim)

    # f32 MXU-input path.
    prep_f32 = prepare_params(params, num_heads=num_heads,
                              quantum_dim=quantum_dim, compute_dtype=jnp.float32)
    out = jax.block_until_ready(quantum_attention(x, prep_f32))
    assert out.shape == (B, S, hidden_dim)
    assert jnp.allclose(out, ref, atol=1e-3, rtol=1e-3), "f32 mismatch vs reference"

    # bf16 MXU-input path (valid on v5e/v6e/v7x); accum/norm/softmax stay f32.
    prep_bf16 = prepare_params(params, num_heads=num_heads,
                               quantum_dim=quantum_dim, compute_dtype=jnp.bfloat16)
    out_bf16 = jax.block_until_ready(quantum_attention(x, prep_bf16))
    assert float(jnp.max(jnp.abs(out_bf16 - ref))) < 1e-2, "bf16 path diverged"

    print("KERNEL_OK")
</pallas_src>

<mosaic_0001>
module attributes {stable_mosaic.version = 11 : i64} {
  func.func @_quantum_attention_kernel(%arg0: i32, %arg1: memref<1x8x32xf32, #tpu.memory_space<vmem>>, %arg2: memref<32x288xf32, #tpu.memory_space<vmem>>, %arg3: memref<1x288xf32, #tpu.memory_space<vmem>>, %arg4: memref<128x128xf32, #tpu.memory_space<vmem>>, %arg5: memref<128x128xf32, #tpu.memory_space<vmem>>, %arg6: memref<32x32xf32, #tpu.memory_space<vmem>>, %arg7: memref<1x32xf32, #tpu.memory_space<vmem>>, %arg8: memref<1x8x32xf32, #tpu.memory_space<vmem>>, %arg9: memref<1x4x8x8xf32, #tpu.memory_space<vmem>>, %arg10: memref<1x4x8x8xf32, #tpu.memory_space<vmem>>, %arg11: memref<1x4x8x8xf32, #tpu.memory_space<vmem>>, %arg12: memref<1x4x8x8xf32, #tpu.memory_space<vmem>>) attributes {dimension_semantics = [#tpu.dimension_semantics<parallel>], iteration_bounds = array<i64: 2>, scalar_prefetch = 0 : i64, scratch_operands = 4 : i64, tpu.core_type = #tpu.core_type<tc>, window_params = [{transform_indices = @transform_0, window_bounds = array<i64: 1, 8, 32>}, {pipeline_mode = #tpu.pipeline_mode<synchronous>, transform_indices = @transform_1, window_bounds = array<i64: 32, 288>}, {pipeline_mode = #tpu.pipeline_mode<synchronous>, transform_indices = @transform_2, window_bounds = array<i64: 1, 288>}, {pipeline_mode = #tpu.pipeline_mode<synchronous>, transform_indices = @transform_3, window_bounds = array<i64: 128, 128>}, {pipeline_mode = #tpu.pipeline_mode<synchronous>, transform_indices = @transform_4, window_bounds = array<i64: 128, 128>}, {pipeline_mode = #tpu.pipeline_mode<synchronous>, transform_indices = @transform_5, window_bounds = array<i64: 32, 32>}, {pipeline_mode = #tpu.pipeline_mode<synchronous>, transform_indices = @transform_6, window_bounds = array<i64: 1, 32>}, {transform_indices = @transform_7, window_bounds = array<i64: 1, 8, 32>}]} {
    %c0 = arith.constant 0 : index
    %c0_0 = arith.constant 0 : index
    %c0_1 = arith.constant 0 : index
    %0 = vector.load %arg1[%c0, %c0_0, %c0_1] : memref<1x8x32xf32, #tpu.memory_space<vmem>>, vector<1x8x32xf32>
    %1 = vector.shape_cast %0 : vector<1x8x32xf32> to vector<8x32xf32>
    %c0_2 = arith.constant 0 : index
    %c0_3 = arith.constant 0 : index
    %2 = vector.load %arg2[%c0_2, %c0_3] : memref<32x288xf32, #tpu.memory_space<vmem>>, vector<32x288xf32>
    %cst = arith.constant dense<0.000000e+00> : vector<8x288xf32>
    %3 = tpu.matmul %1, %2, %cst {dimension_numbers = #tpu.dot_dimension_numbers<[1], [0], [0], [1], [0, 0, 1, 1], [], []>} : vector<8x32xf32>, vector<32x288xf32>, vector<8x288xf32> -> vector<8x288xf32>
    %c0_4 = arith.constant 0 : index
    %c0_5 = arith.constant 0 : index
    %4 = vector.load %arg3[%c0_4, %c0_5] : memref<1x288xf32, #tpu.memory_space<vmem>>, vector<1x288xf32>
    %5 = vector.broadcast %4 : vector<1x288xf32> to vector<8x288xf32>
    %6 = arith.addf %3, %5 : vector<8x288xf32>
    %7 = vector.extract_strided_slice %6 {offsets = [0, 0], sizes = [8, 128], strides = [1, 1]} : vector<8x288xf32> to vector<8x128xf32>
    %8 = vector.extract_strided_slice %6 {offsets = [0, 128], sizes = [8, 128], strides = [1, 1]} : vector<8x288xf32> to vector<8x128xf32>
    %9 = vector.extract_strided_slice %6 {offsets = [0, 256], sizes = [8, 32], strides = [1, 1]} : vector<8x288xf32> to vector<8x32xf32>
    %10 = arith.mulf %7, %7 : vector<8x128xf32>
    %c0_6 = arith.constant 0 : index
    %c0_7 = arith.constant 0 : index
    %11 = vector.load %arg4[%c0_6, %c0_7] : memref<128x128xf32, #tpu.memory_space<vmem>>, vector<128x128xf32>
    %cst_8 = arith.constant dense<0.000000e+00> : vector<8x128xf32>
    %12 = tpu.matmul %10, %11, %cst_8 {dimension_numbers = #tpu.dot_dimension_numbers<[1], [0], [0], [1], [0, 0, 1, 1], [], []>} : vector<8x128xf32>, vector<128x128xf32>, vector<8x128xf32> -> vector<8x128xf32>
    %c0_9 = arith.constant 0 : index
    %c0_10 = arith.constant 0 : index
    %13 = vector.load %arg5[%c0_9, %c0_10] : memref<128x128xf32, #tpu.memory_space<vmem>>, vector<128x128xf32>
    %cst_11 = arith.constant dense<0.000000e+00> : vector<8x128xf32>
    %14 = tpu.matmul %12, %13, %cst_11 {dimension_numbers = #tpu.dot_dimension_numbers<[1], [0], [0], [1], [0, 0, 1, 1], [], []>} : vector<8x128xf32>, vector<128x128xf32>, vector<8x128xf32> -> vector<8x128xf32>
    %cst_12 = arith.constant 9.99999996E-13 : f32
    %15 = vector.broadcast %cst_12 : f32 to vector<8x128xf32>
    %16 = arith.addf %14, %15 : vector<8x128xf32>
    %17 = math.rsqrt %16 : vector<8x128xf32>
    %18 = arith.mulf %7, %17 : vector<8x128xf32>
    %19 = arith.mulf %8, %8 : vector<8x128xf32>
    %c0_13 = arith.constant 0 : index
    %c0_14 = arith.constant 0 : index
    %20 = vector.load %arg4[%c0_13, %c0_14] : memref<128x128xf32, #tpu.memory_space<vmem>>, vector<128x128xf32>
    %cst_15 = arith.constant dense<0.000000e+00> : vector<8x128xf32>
    %21 = tpu.matmul %19, %20, %cst_15 {dimension_numbers = #tpu.dot_dimension_numbers<[1], [0], [0], [1], [0, 0, 1, 1], [], []>} : vector<8x128xf32>, vector<128x128xf32>, vector<8x128xf32> -> vector<8x128xf32>
    %c0_16 = arith.constant 0 : index
    %c0_17 = arith.constant 0 : index
    %22 = vector.load %arg5[%c0_16, %c0_17] : memref<128x128xf32, #tpu.memory_space<vmem>>, vector<128x128xf32>
    %cst_18 = arith.constant dense<0.000000e+00> : vector<8x128xf32>
    %23 = tpu.matmul %21, %22, %cst_18 {dimension_numbers = #tpu.dot_dimension_numbers<[1], [0], [0], [1], [0, 0, 1, 1], [], []>} : vector<8x128xf32>, vector<128x128xf32>, vector<8x128xf32> -> vector<8x128xf32>
    %cst_19 = arith.constant 9.99999996E-13 : f32
    %24 = vector.broadcast %cst_19 : f32 to vector<8x128xf32>
    %25 = arith.addf %23, %24 : vector<8x128xf32>
    %26 = math.rsqrt %25 : vector<8x128xf32>
    %27 = arith.mulf %8, %26 : vector<8x128xf32>
    %28 = vector.extract_strided_slice %18 {offsets = [0, 0], sizes = [8, 32], strides = [1, 1]} : vector<8x128xf32> to vector<8x32xf32>
    %29 = vector.shape_cast %28 : vector<8x32xf32> to vector<1x8x4x8xf32>
    %30 = tpu.transpose %29, [0, 2, 1, 3] : vector<1x8x4x8xf32> -> vector<1x4x8x8xf32>
    %c0_20 = arith.constant 0 : index
    %c0_21 = arith.constant 0 : index
    %c0_22 = arith.constant 0 : index
    %c0_23 = arith.constant 0 : index
    %31 = vector.load %arg9[%c0_20, %c0_21, %c0_22, %c0_23] : memref<1x4x8x8xf32, #tpu.memory_space<vmem>>, vector<1x4x8x8xf32>
    tpu.vector_store %arg9[%c0_20, %c0_21, %c0_22, %c0_23], %30 {strides = array<i32>} : memref<1x4x8x8xf32, #tpu.memory_space<vmem>>, vector<1x4x8x8xf32>,
    %32 = vector.extract_strided_slice %27 {offsets = [0, 0], sizes = [8, 32], strides = [1, 1]} : vector<8x128xf32> to vector<8x32xf32>
    %33 = vector.shape_cast %32 : vector<8x32xf32> to vector<1x8x4x8xf32>
    %34 = tpu.transpose %33, [0, 2, 1, 3] : vector<1x8x4x8xf32> -> vector<1x4x8x8xf32>
    %c0_24 = arith.constant 0 : index
    %c0_25 = arith.constant 0 : index
    %c0_26 = arith.constant 0 : index
    %c0_27 = arith.constant 0 : index
    %35 = vector.load %arg10[%c0_24, %c0_25, %c0_26, %c0_27] : memref<1x4x8x8xf32, #tpu.memory_space<vmem>>, vector<1x4x8x8xf32>
    tpu.vector_store %arg10[%c0_24, %c0_25, %c0_26, %c0_27], %34 {strides = array<i32>} : memref<1x4x8x8xf32, #tpu.memory_space<vmem>>, vector<1x4x8x8xf32>,
    %36 = vector.shape_cast %9 : vector<8x32xf32> to vector<1x8x4x8xf32>
    %37 = tpu.transpose %36, [0, 2, 1, 3] : vector<1x8x4x8xf32> -> vector<1x4x8x8xf32>
    %c0_28 = arith.constant 0 : index
    %c0_29 = arith.constant 0 : index
    %c0_30 = arith.constant 0 : index
    %c0_31 = arith.constant 0 : index
    %38 = vector.load %arg11[%c0_28, %c0_29, %c0_30, %c0_31] : memref<1x4x8x8xf32, #tpu.memory_space<vmem>>, vector<1x4x8x8xf32>
    tpu.vector_store %arg11[%c0_28, %c0_29, %c0_30, %c0_31], %37 {strides = array<i32>} : memref<1x4x8x8xf32, #tpu.memory_space<vmem>>, vector<1x4x8x8xf32>,
    %c0_i32 = arith.constant 0 : i32
    %39 = arith.index_cast %c0_i32 : i32 to index
    %c0_32 = arith.constant 0 : index
    %c0_33 = arith.constant 0 : index
    %c0_34 = arith.constant 0 : index
    %40 = vector.load %arg9[%39, %c0_32, %c0_33, %c0_34] : memref<1x4x8x8xf32, #tpu.memory_space<vmem>>, vector<1x4x8x8xf32>
    %41 = vector.shape_cast %40 : vector<1x4x8x8xf32> to vector<4x8x8xf32>
    %42 = arith.index_cast %c0_i32 : i32 to index
    %c0_35 = arith.constant 0 : index
    %c0_36 = arith.constant 0 : index
    %c0_37 = arith.constant 0 : index
    %43 = vector.load %arg10[%42, %c0_35, %c0_36, %c0_37] : memref<1x4x8x8xf32, #tpu.memory_space<vmem>>, vector<1x4x8x8xf32>
    %44 = vector.shape_cast %43 : vector<1x4x8x8xf32> to vector<4x8x8xf32>
    %45 = arith.index_cast %c0_i32 : i32 to index
    %c0_38 = arith.constant 0 : index
    %c0_39 = arith.constant 0 : index
    %c0_40 = arith.constant 0 : index
    %46 = vector.load %arg11[%45, %c0_38, %c0_39, %c0_40] : memref<1x4x8x8xf32, #tpu.memory_space<vmem>>, vector<1x4x8x8xf32>
    %47 = vector.shape_cast %46 : vector<1x4x8x8xf32> to vector<4x8x8xf32>
    "tpu.trace_start"() <{level = 10 : i32, message = "hsd,htd->hst"}> : () -> ()
    %cst_41 = arith.constant dense<0.000000e+00> : vector<4x8x8xf32>
    %48 = tpu.matmul %41, %44, %cst_41 {dimension_numbers = #tpu.dot_dimension_numbers<[2], [2], [1], [1], [0, 0, 0, 1, 1, 1], [0], [0]>} : vector<4x8x8xf32>, vector<4x8x8xf32>, vector<4x8x8xf32> -> vector<4x8x8xf32>
    "tpu.trace_stop"() : () -> ()
    %cst_42 = arith.constant 0.353553385 : f32
    %49 = vector.broadcast %cst_42 : f32 to vector<4x8x8xf32>
    %50 = arith.mulf %48, %49 : vector<4x8x8xf32>
    %cst_43 = arith.constant dense<0xFF800000> : vector<4x8xf32>
    %51 = vector.multi_reduction <maximumf>, %50, %cst_43 [2] : vector<4x8x8xf32> to vector<4x8xf32>
    %52 = vector.shape_cast %51 : vector<4x8xf32> to vector<4x8x1xf32>
    %53 = vector.broadcast %52 : vector<4x8x1xf32> to vector<4x8x8xf32>
    %54 = arith.subf %50, %53 : vector<4x8x8xf32>
    %55 = math.exp %54 : vector<4x8x8xf32>
    %cst_44 = arith.constant dense<0.000000e+00> : vector<4x8xf32>
    %56 = vector.multi_reduction <add>, %55, %cst_44 [2] : vector<4x8x8xf32> to vector<4x8xf32>
    %57 = vector.shape_cast %56 : vector<4x8xf32> to vector<4x8x1xf32>
    %58 = tpu.reciprocal %57 : vector<4x8x1xf32> -> vector<4x8x1xf32>
    %59 = vector.broadcast %58 : vector<4x8x1xf32> to vector<4x8x8xf32>
    %60 = arith.mulf %55, %59 : vector<4x8x8xf32>
    "tpu.trace_start"() <{level = 10 : i32, message = "hst,htd->hsd"}> : () -> ()
    %cst_45 = arith.constant dense<0.000000e+00> : vector<4x8x8xf32>
    %61 = tpu.matmul %60, %47, %cst_45 {dimension_numbers = #tpu.dot_dimension_numbers<[2], [1], [1], [2], [0, 0, 0, 1, 1, 2], [0], [0]>} : vector<4x8x8xf32>, vector<4x8x8xf32>, vector<4x8x8xf32> -> vector<4x8x8xf32>
    "tpu.trace_stop"() : () -> ()
    %62 = arith.index_cast %c0_i32 : i32 to index
    %c0_46 = arith.constant 0 : index
    %c0_47 = arith.constant 0 : index
    %c0_48 = arith.constant 0 : index
    %63 = vector.load %arg12[%62, %c0_46, %c0_47, %c0_48] : memref<1x4x8x8xf32, #tpu.memory_space<vmem>>, vector<1x4x8x8xf32>
    %64 = vector.shape_cast %63 : vector<1x4x8x8xf32> to vector<4x8x8xf32>
    %65 = vector.shape_cast %61 : vector<4x8x8xf32> to vector<1x4x8x8xf32>
    tpu.vector_store %arg12[%62, %c0_46, %c0_47, %c0_48], %65 {strides = array<i32>} : memref<1x4x8x8xf32, #tpu.memory_space<vmem>>, vector<1x4x8x8xf32>,
    %c1_i32 = arith.constant 1 : i32
    %c0_49 = arith.constant 0 : index
    %c0_50 = arith.constant 0 : index
    %c0_51 = arith.constant 0 : index
    %c0_52 = arith.constant 0 : index
    %66 = vector.load %arg12[%c0_49, %c0_50, %c0_51, %c0_52] : memref<1x4x8x8xf32, #tpu.memory_space<vmem>>, vector<1x4x8x8xf32>
    %67 = tpu.transpose %66, [0, 2, 1, 3] : vector<1x4x8x8xf32> -> vector<1x8x4x8xf32>
    %68 = vector.shape_cast %67 : vector<1x8x4x8xf32> to vector<8x32xf32>
    %c0_53 = arith.constant 0 : index
    %c0_54 = arith.constant 0 : index
    %69 = vector.load %arg6[%c0_53, %c0_54] : memref<32x32xf32, #tpu.memory_space<vmem>>, vector<32x32xf32>
    %cst_55 = arith.constant dense<0.000000e+00> : vector<8x32xf32>
    %70 = tpu.matmul %68, %69, %cst_55 {dimension_numbers = #tpu.dot_dimension_numbers<[1], [0], [0], [1], [0, 0, 1, 1], [], []>} : vector<8x32xf32>, vector<32x32xf32>, vector<8x32xf32> -> vector<8x32xf32>
    %c0_56 = arith.constant 0 : index
    %c0_57 = arith.constant 0 : index
    %71 = vector.load %arg7[%c0_56, %c0_57] : memref<1x32xf32, #tpu.memory_space<vmem>>, vector<1x32xf32>
    %72 = vector.broadcast %71 : vector<1x32xf32> to vector<8x32xf32>
    %73 = arith.addf %70, %72 : vector<8x32xf32>
    %74 = vector.shape_cast %73 : vector<8x32xf32> to vector<1x8x32xf32>
    %c0_58 = arith.constant 0 : index
    %c0_59 = arith.constant 0 : index
    %c0_60 = arith.constant 0 : index
    %75 = vector.load %arg8[%c0_58, %c0_59, %c0_60] : memref<1x8x32xf32, #tpu.memory_space<vmem>>, vector<1x8x32xf32>
    tpu.vector_store %arg8[%c0_58, %c0_59, %c0_60], %74 {strides = array<i32>} : memref<1x8x32xf32, #tpu.memory_space<vmem>>, vector<1x8x32xf32>,
    return
  }
  func.func @transform_0(%arg0: i32) -> (i32, i32, i32) {
    %c0_i32 = arith.constant 0 : i32
    %c0_i32_0 = arith.constant 0 : i32
    %c0_i32_1 = arith.constant 0 : i32
    return %arg0, %c0_i32, %c0_i32_0 : i32, i32, i32
  }
  func.func @transform_1(%arg0: i32) -> (i32, i32) {
    %c0_i32 = arith.constant 0 : i32
    %c0_i32_0 = arith.constant 0 : i32
    %c0_i32_1 = arith.constant 0 : i32
    return %c0_i32, %c0_i32_0 : i32, i32
  }
  func.func @transform_2(%arg0: i32) -> (i32, i32) {
    %c0_i32 = arith.constant 0 : i32
    %c0_i32_0 = arith.constant 0 : i32
    %c0_i32_1 = arith.constant 0 : i32
    return %c0_i32, %c0_i32_0 : i32, i32
  }
  func.func @transform_3(%arg0: i32) -> (i32, i32) {
    %c0_i32 = arith.constant 0 : i32
    %c0_i32_0 = arith.constant 0 : i32
    %c0_i32_1 = arith.constant 0 : i32
    return %c0_i32, %c0_i32_0 : i32, i32
  }
  func.func @transform_4(%arg0: i32) -> (i32, i32) {
    %c0_i32 = arith.constant 0 : i32
    %c0_i32_0 = arith.constant 0 : i32
    %c0_i32_1 = arith.constant 0 : i32
    return %c0_i32, %c0_i32_0 : i32, i32
  }
  func.func @transform_5(%arg0: i32) -> (i32, i32) {
    %c0_i32 = arith.constant 0 : i32
    %c0_i32_0 = arith.constant 0 : i32
    %c0_i32_1 = arith.constant 0 : i32
    return %c0_i32, %c0_i32_0 : i32, i32
  }
  func.func @transform_6(%arg0: i32) -> (i32, i32) {
    %c0_i32 = arith.constant 0 : i32
    %c0_i32_0 = arith.constant 0 : i32
    %c0_i32_1 = arith.constant 0 : i32
    return %c0_i32, %c0_i32_0 : i32, i32
  }
  func.func @transform_7(%arg0: i32) -> (i32, i32, i32) {
    %c0_i32 = arith.constant 0 : i32
    %c0_i32_0 = arith.constant 0 : i32
    %c0_i32_1 = arith.constant 0 : i32
    return %arg0, %c0_i32, %c0_i32_0 : i32, i32, i32
  }
}

module attributes {stable_mosaic.version = 11 : i64} {
  func.func @_quantum_attention_kernel(%arg0: i32, %arg1: memref<1x8x32xf32, #tpu.memory_space<vmem>>, %arg2: memref<32x288xf32, #tpu.memory_space<vmem>>, %arg3: memref<1x288xf32, #tpu.memory_space<vmem>>, %arg4: memref<128x128xf32, #tpu.memory_space<vmem>>, %arg5: memref<128x128xf32, #tpu.memory_space<vmem>>, %arg6: memref<32x32xf32, #tpu.memory_space<vmem>>, %arg7: memref<1x32xf32, #tpu.memory_space<vmem>>, %arg8: memref<1x8x32xf32, #tpu.memory_space<vmem>>, %arg9: memref<1x4x8x8xf32, #tpu.memory_space<vmem>>, %arg10: memref<1x4x8x8xf32, #tpu.memory_space<vmem>>, %arg11: memref<1x4x8x8xf32, #tpu.memory_space<vmem>>, %arg12: memref<1x4x8x8xf32, #tpu.memory_space<vmem>>) attributes {dimension_semantics = [#tpu.dimension_semantics<parallel>], iteration_bounds = array<i64: 2>, scalar_prefetch = 0 : i64, scratch_operands = 4 : i64, tpu.core_type = #tpu.core_type<tc>, window_params = [{transform_indices = @transform_0, window_bounds = array<i64: 1, 8, 32>}, {pipeline_mode = #tpu.pipeline_mode<synchronous>, transform_indices = @transform_1, window_bounds = array<i64: 32, 288>}, {pipeline_mode = #tpu.pipeline_mode<synchronous>, transform_indices = @transform_2, window_bounds = array<i64: 1, 288>}, {pipeline_mode = #tpu.pipeline_mode<synchronous>, transform_indices = @transform_3, window_bounds = array<i64: 128, 128>}, {pipeline_mode = #tpu.pipeline_mode<synchronous>, transform_indices = @transform_4, window_bounds = array<i64: 128, 128>}, {pipeline_mode = #tpu.pipeline_mode<synchronous>, transform_indices = @transform_5, window_bounds = array<i64: 32, 32>}, {pipeline_mode = #tpu.pipeline_mode<synchronous>, transform_indices = @transform_6, window_bounds = array<i64: 1, 32>}, {transform_indices = @transform_7, window_bounds = array<i64: 1, 8, 32>}]} {
    %c0 = arith.constant 0 : index
    %c0_0 = arith.constant 0 : index
    %c0_1 = arith.constant 0 : index
    %0 = vector.load %arg1[%c0, %c0_0, %c0_1] : memref<1x8x32xf32, #tpu.memory_space<vmem>>, vector<1x8x32xf32>
    %1 = vector.shape_cast %0 : vector<1x8x32xf32> to vector<8x32xf32>
    %c0_2 = arith.constant 0 : index
    %c0_3 = arith.constant 0 : index
    %2 = vector.load %arg2[%c0_2, %c0_3] : memref<32x288xf32, #tpu.memory_space<vmem>>, vector<32x288xf32>
    %cst = arith.constant dense<0.000000e+00> : vector<8x288xf32>
    %3 = tpu.matmul %1, %2, %cst {dimension_numbers = #tpu.dot_dimension_numbers<[1], [0], [0], [1], [0, 0, 1, 1], [], []>} : vector<8x32xf32>, vector<32x288xf32>, vector<8x288xf32> -> vector<8x288xf32>
    %c0_4 = arith.constant 0 : index
    %c0_5 = arith.constant 0 : index
    %4 = vector.load %arg3[%c0_4, %c0_5] : memref<1x288xf32, #tpu.memory_space<vmem>>, vector<1x288xf32>
    %5 = vector.broadcast %4 : vector<1x288xf32> to vector<8x288xf32>
    %6 = arith.addf %3, %5 : vector<8x288xf32>
    %7 = vector.extract_strided_slice %6 {offsets = [0, 0], sizes = [8, 128], strides = [1, 1]} : vector<8x288xf32> to vector<8x128xf32>
    %8 = vector.extract_strided_slice %6 {offsets = [0, 128], sizes = [8, 128], strides = [1, 1]} : vector<8x288xf32> to vector<8x128xf32>
    %9 = vector.extract_strided_slice %6 {offsets = [0, 256], sizes = [8, 32], strides = [1, 1]} : vector<8x288xf32> to vector<8x32xf32>
    %10 = arith.mulf %7, %7 : vector<8x128xf32>
    %c0_6 = arith.constant 0 : index
    %c0_7 = arith.constant 0 : index
    %11 = vector.load %arg4[%c0_6, %c0_7] : memref<128x128xf32, #tpu.memory_space<vmem>>, vector<128x128xf32>
    %cst_8 = arith.constant dense<0.000000e+00> : vector<8x128xf32>
    %12 = tpu.matmul %10, %11, %cst_8 {dimension_numbers = #tpu.dot_dimension_numbers<[1], [0], [0], [1], [0, 0, 1, 1], [], []>} : vector<8x128xf32>, vector<128x128xf32>, vector<8x128xf32> -> vector<8x128xf32>
    %c0_9 = arith.constant 0 : index
    %c0_10 = arith.constant 0 : index
    %13 = vector.load %arg5[%c0_9, %c0_10] : memref<128x128xf32, #tpu.memory_space<vmem>>, vector<128x128xf32>
    %cst_11 = arith.constant dense<0.000000e+00> : vector<8x128xf32>
    %14 = tpu.matmul %12, %13, %cst_11 {dimension_numbers = #tpu.dot_dimension_numbers<[1], [0], [0], [1], [0, 0, 1, 1], [], []>} : vector<8x128xf32>, vector<128x128xf32>, vector<8x128xf32> -> vector<8x128xf32>
    %cst_12 = arith.constant 9.99999996E-13 : f32
    %15 = vector.broadcast %cst_12 : f32 to vector<8x128xf32>
    %16 = arith.addf %14, %15 : vector<8x128xf32>
    %17 = math.rsqrt %16 : vector<8x128xf32>
    %18 = arith.mulf %7, %17 : vector<8x128xf32>
    %19 = arith.mulf %8, %8 : vector<8x128xf32>
    %c0_13 = arith.constant 0 : index
    %c0_14 = arith.constant 0 : index
    %20 = vector.load %arg4[%c0_13, %c0_14] : memref<128x128xf32, #tpu.memory_space<vmem>>, vector<128x128xf32>
    %cst_15 = arith.constant dense<0.000000e+00> : vector<8x128xf32>
    %21 = tpu.matmul %19, %20, %cst_15 {dimension_numbers = #tpu.dot_dimension_numbers<[1], [0], [0], [1], [0, 0, 1, 1], [], []>} : vector<8x128xf32>, vector<128x128xf32>, vector<8x128xf32> -> vector<8x128xf32>
    %c0_16 = arith.constant 0 : index
    %c0_17 = arith.constant 0 : index
    %22 = vector.load %arg5[%c0_16, %c0_17] : memref<128x128xf32, #tpu.memory_space<vmem>>, vector<128x128xf32>
    %cst_18 = arith.constant dense<0.000000e+00> : vector<8x128xf32>
    %23 = tpu.matmul %21, %22, %cst_18 {dimension_numbers = #tpu.dot_dimension_numbers<[1], [0], [0], [1], [0, 0, 1, 1], [], []>} : vector<8x128xf32>, vector<128x128xf32>, vector<8x128xf32> -> vector<8x128xf32>
    %cst_19 = arith.constant 9.99999996E-13 : f32
    %24 = vector.broadcast %cst_19 : f32 to vector<8x128xf32>
    %25 = arith.addf %23, %24 : vector<8x128xf32>
    %26 = math.rsqrt %25 : vector<8x128xf32>
    %27 = arith.mulf %8, %26 : vector<8x128xf32>
    %28 = vector.extract_strided_slice %18 {offsets = [0, 0], sizes = [8, 32], strides = [1, 1]} : vector<8x128xf32> to vector<8x32xf32>
    %29 = vector.shape_cast %28 : vector<8x32xf32> to vector<1x8x4x8xf32>
    %30 = tpu.transpose %29, [0, 2, 1, 3] : vector<1x8x4x8xf32> -> vector<1x4x8x8xf32>
    %c0_20 = arith.constant 0 : index
    %c0_21 = arith.constant 0 : index
    %c0_22 = arith.constant 0 : index
    %c0_23 = arith.constant 0 : index
    %31 = vector.load %arg9[%c0_20, %c0_21, %c0_22, %c0_23] : memref<1x4x8x8xf32, #tpu.memory_space<vmem>>, vector<1x4x8x8xf32>
    tpu.vector_store %arg9[%c0_20, %c0_21, %c0_22, %c0_23], %30 {strides = array<i32>} : memref<1x4x8x8xf32, #tpu.memory_space<vmem>>, vector<1x4x8x8xf32>,
    %32 = vector.extract_strided_slice %27 {offsets = [0, 0], sizes = [8, 32], strides = [1, 1]} : vector<8x128xf32> to vector<8x32xf32>
    %33 = vector.shape_cast %32 : vector<8x32xf32> to vector<1x8x4x8xf32>
    %34 = tpu.transpose %33, [0, 2, 1, 3] : vector<1x8x4x8xf32> -> vector<1x4x8x8xf32>
    %c0_24 = arith.constant 0 : index
    %c0_25 = arith.constant 0 : index
    %c0_26 = arith.constant 0 : index
    %c0_27 = arith.constant 0 : index
    %35 = vector.load %arg10[%c0_24, %c0_25, %c0_26, %c0_27] : memref<1x4x8x8xf32, #tpu.memory_space<vmem>>, vector<1x4x8x8xf32>
    tpu.vector_store %arg10[%c0_24, %c0_25, %c0_26, %c0_27], %34 {strides = array<i32>} : memref<1x4x8x8xf32, #tpu.memory_space<vmem>>, vector<1x4x8x8xf32>,
    %36 = vector.shape_cast %9 : vector<8x32xf32> to vector<1x8x4x8xf32>
    %37 = tpu.transpose %36, [0, 2, 1, 3] : vector<1x8x4x8xf32> -> vector<1x4x8x8xf32>
    %c0_28 = arith.constant 0 : index
    %c0_29 = arith.constant 0 : index
    %c0_30 = arith.constant 0 : index
    %c0_31 = arith.constant 0 : index
    %38 = vector.load %arg11[%c0_28, %c0_29, %c0_30, %c0_31] : memref<1x4x8x8xf32, #tpu.memory_space<vmem>>, vector<1x4x8x8xf32>
    tpu.vector_store %arg11[%c0_28, %c0_29, %c0_30, %c0_31], %37 {strides = array<i32>} : memref<1x4x8x8xf32, #tpu.memory_space<vmem>>, vector<1x4x8x8xf32>,
    %c0_i32 = arith.constant 0 : i32
    %39 = arith.index_cast %c0_i32 : i32 to index
    %c0_32 = arith.constant 0 : index
    %c0_33 = arith.constant 0 : index
    %c0_34 = arith.constant 0 : index
    %40 = vector.load %arg9[%39, %c0_32, %c0_33, %c0_34] : memref<1x4x8x8xf32, #tpu.memory_space<vmem>>, vector<1x4x8x8xf32>
    %41 = vector.shape_cast %40 : vector<1x4x8x8xf32> to vector<4x8x8xf32>
    %42 = arith.index_cast %c0_i32 : i32 to index
    %c0_35 = arith.constant 0 : index
    %c0_36 = arith.constant 0 : index
    %c0_37 = arith.constant 0 : index
    %43 = vector.load %arg10[%42, %c0_35, %c0_36, %c0_37] : memref<1x4x8x8xf32, #tpu.memory_space<vmem>>, vector<1x4x8x8xf32>
    %44 = vector.shape_cast %43 : vector<1x4x8x8xf32> to vector<4x8x8xf32>
    %45 = arith.index_cast %c0_i32 : i32 to index
    %c0_38 = arith.constant 0 : index
    %c0_39 = arith.constant 0 : index
    %c0_40 = arith.constant 0 : index
    %46 = vector.load %arg11[%45, %c0_38, %c0_39, %c0_40] : memref<1x4x8x8xf32, #tpu.memory_space<vmem>>, vector<1x4x8x8xf32>
    %47 = vector.shape_cast %46 : vector<1x4x8x8xf32> to vector<4x8x8xf32>
    "tpu.trace_start"() <{level = 10 : i32, message = "hsd,htd->hst"}> : () -> ()
    %cst_41 = arith.constant dense<0.000000e+00> : vector<4x8x8xf32>
    %48 = tpu.matmul %41, %44, %cst_41 {dimension_numbers = #tpu.dot_dimension_numbers<[2], [2], [1], [1], [0, 0, 0, 1, 1, 1], [0], [0]>} : vector<4x8x8xf32>, vector<4x8x8xf32>, vector<4x8x8xf32> -> vector<4x8x8xf32>
    "tpu.trace_stop"() : () -> ()
    %cst_42 = arith.constant 0.353553385 : f32
    %49 = vector.broadcast %cst_42 : f32 to vector<4x8x8xf32>
    %50 = arith.mulf %48, %49 : vector<4x8x8xf32>
    %cst_43 = arith.constant dense<0xFF800000> : vector<4x8xf32>
    %51 = vector.multi_reduction <maximumf>, %50, %cst_43 [2] : vector<4x8x8xf32> to vector<4x8xf32>
    %52 = vector.shape_cast %51 : vector<4x8xf32> to vector<4x8x1xf32>
    %53 = vector.broadcast %52 : vector<4x8x1xf32> to vector<4x8x8xf32>
    %54 = arith.subf %50, %53 : vector<4x8x8xf32>
    %55 = math.exp %54 : vector<4x8x8xf32>
    %cst_44 = arith.constant dense<0.000000e+00> : vector<4x8xf32>
    %56 = vector.multi_reduction <add>, %55, %cst_44 [2] : vector<4x8x8xf32> to vector<4x8xf32>
    %57 = vector.shape_cast %56 : vector<4x8xf32> to vector<4x8x1xf32>
    %58 = tpu.reciprocal %57 : vector<4x8x1xf32> -> vector<4x8x1xf32>
    %59 = vector.broadcast %58 : vector<4x8x1xf32> to vector<4x8x8xf32>
    %60 = arith.mulf %55, %59 : vector<4x8x8xf32>
    "tpu.trace_start"() <{level = 10 : i32, message = "hst,htd->hsd"}> : () -> ()
    %cst_45 = arith.constant dense<0.000000e+00> : vector<4x8x8xf32>
    %61 = tpu.matmul %60, %47, %cst_45 {dimension_numbers = #tpu.dot_dimension_numbers<[2], [1], [1], [2], [0, 0, 0, 1, 1, 2], [0], [0]>} : vector<4x8x8xf32>, vector<4x8x8xf32>, vector<4x8x8xf32> -> vector<4x8x8xf32>
    "tpu.trace_stop"() : () -> ()
    %62 = arith.index_cast %c0_i32 : i32 to index
    %c0_46 = arith.constant 0 : index
    %c0_47 = arith.constant 0 : index
    %c0_48 = arith.constant 0 : index
    %63 = vector.load %arg12[%62, %c0_46, %c0_47, %c0_48] : memref<1x4x8x8xf32, #tpu.memory_space<vmem>>, vector<1x4x8x8xf32>
    %64 = vector.shape_cast %63 : vector<1x4x8x8xf32> to vector<4x8x8xf32>
    %65 = vector.shape_cast %61 : vector<4x8x8xf32> to vector<1x4x8x8xf32>
    tpu.vector_store %arg12[%62, %c0_46, %c0_47, %c0_48], %65 {strides = array<i32>} : memref<1x4x8x8xf32, #tpu.memory_space<vmem>>, vector<1x4x8x8xf32>,
    %c1_i32 = arith.constant 1 : i32
    %c0_49 = arith.constant 0 : index
    %c0_50 = arith.constant 0 : index
    %c0_51 = arith.constant 0 : index
    %c0_52 = arith.constant 0 : index
    %66 = vector.load %arg12[%c0_49, %c0_50, %c0_51, %c0_52] : memref<1x4x8x8xf32, #tpu.memory_space<vmem>>, vector<1x4x8x8xf32>
    %67 = tpu.transpose %66, [0, 2, 1, 3] : vector<1x4x8x8xf32> -> vector<1x8x4x8xf32>
    %68 = vector.shape_cast %67 : vector<1x8x4x8xf32> to vector<8x32xf32>
    %c0_53 = arith.constant 0 : index
    %c0_54 = arith.constant 0 : index
    %69 = vector.load %arg6[%c0_53, %c0_54] : memref<32x32xf32, #tpu.memory_space<vmem>>, vector<32x32xf32>
    %cst_55 = arith.constant dense<0.000000e+00> : vector<8x32xf32>
    %70 = tpu.matmul %68, %69, %cst_55 {dimension_numbers = #tpu.dot_dimension_numbers<[1], [0], [0], [1], [0, 0, 1, 1], [], []>} : vector<8x32xf32>, vector<32x32xf32>, vector<8x32xf32> -> vector<8x32xf32>
    %c0_56 = arith.constant 0 : index
    %c0_57 = arith.constant 0 : index
    %71 = vector.load %arg7[%c0_56, %c0_57] : memref<1x32xf32, #tpu.memory_space<vmem>>, vector<1x32xf32>
    %72 = vector.broadcast %71 : vector<1x32xf32> to vector<8x32xf32>
    %73 = arith.addf %70, %72 : vector<8x32xf32>
    %74 = vector.shape_cast %73 : vector<8x32xf32> to vector<1x8x32xf32>
    %c0_58 = arith.constant 0 : index
    %c0_59 = arith.constant 0 : index
    %c0_60 = arith.constant 0 : index
    %75 = vector.load %arg8[%c0_58, %c0_59, %c0_60] : memref<1x8x32xf32, #tpu.memory_space<vmem>>, vector<1x8x32xf32>
    tpu.vector_store %arg8[%c0_58, %c0_59, %c0_60], %74 {strides = array<i32>} : memref<1x8x32xf32, #tpu.memory_space<vmem>>, vector<1x8x32xf32>,
    return
  }
  func.func @transform_0(%arg0: i32) -> (i32, i32, i32) {
    %c0_i32 = arith.constant 0 : i32
    %c0_i32_0 = arith.constant 0 : i32
    %c0_i32_1 = arith.constant 0 : i32
    return %arg0, %c0_i32, %c0_i32_0 : i32, i32, i32
  }
  func.func @transform_1(%arg0: i32) -> (i32, i32) {
    %c0_i32 = arith.constant 0 : i32
    %c0_i32_0 = arith.constant 0 : i32
    %c0_i32_1 = arith.constant 0 : i32
    return %c0_i32, %c0_i32_0 : i32, i32
  }
  func.func @transform_2(%arg0: i32) -> (i32, i32) {
    %c0_i32 = arith.constant 0 : i32
    %c0_i32_0 = arith.constant 0 : i32
    %c0_i32_1 = arith.constant 0 : i32
    return %c0_i32, %c0_i32_0 : i32, i32
  }
  func.func @transform_3(%arg0: i32) -> (i32, i32) {
    %c0_i32 = arith.constant 0 : i32
    %c0_i32_0 = arith.constant 0 : i32
    %c0_i32_1 = arith.constant 0 : i32
    return %c0_i32, %c0_i32_0 : i32, i32
  }
  func.func @transform_4(%arg0: i32) -> (i32, i32) {
    %c0_i32 = arith.constant 0 : i32
    %c0_i32_0 = arith.constant 0 : i32
    %c0_i32_1 = arith.constant 0 : i32
    return %c0_i32, %c0_i32_0 : i32, i32
  }
  func.func @transform_5(%arg0: i32) -> (i32, i32) {
    %c0_i32 = arith.constant 0 : i32
    %c0_i32_0 = arith.constant 0 : i32
    %c0_i32_1 = arith.constant 0 : i32
    return %c0_i32, %c0_i32_0 : i32, i32
  }
  func.func @transform_6(%arg0: i32) -> (i32, i32) {
    %c0_i32 = arith.constant 0 : i32
    %c0_i32_0 = arith.constant 0 : i32
    %c0_i32_1 = arith.constant 0 : i32
    return %c0_i32, %c0_i32_0 : i32, i32
  }
  func.func @transform_7(%arg0: i32) -> (i32, i32, i32) {
    %c0_i32 = arith.constant 0 : i32
    %c0_i32_0 = arith.constant 0 : i32
    %c0_i32_1 = arith.constant 0 : i32
    return %arg0, %c0_i32, %c0_i32_0 : i32, i32, i32
  }
}

</mosaic_0001>

<bundles_post_ra>
// kernel: tpu_custom_call.1
= control target key start
LH: loop header
LB: loop body
LE: loop exit
PB: predicated region body
PF: predicated region fallthrough
CT: control target
= control target key end

     0   :  { %12 = vsyncpa [#allocation7], 0  ;;  %s3740_s0 = inlined_call_operand.hbm [shape: f32[2,8,32], index: 0, kind: input, shape index: {}]   ;;  %s3741_s1 = inlined_call_operand.hbm [shape: f32[32,288], index: 1, kind: input, shape index: {}]   ;;  %s3742_s2 = inlined_call_operand.vmem [shape: f32[1,288], index: 2, kind: input, shape index: {}]   ;;  %s3743_s3 = inlined_call_operand.hbm [shape: f32[128,128], index: 3, kind: input, shape index: {}]   ;;  %s3744_s4 = inlined_call_operand.hbm [shape: f32[128,128], index: 4, kind: input, shape index: {}]   ;;  %s3745_s5 = inlined_call_operand.hbm [shape: f32[32,32], index: 5, kind: input, shape index: {}]   ;;  %s3746_s6 = inlined_call_operand.vmem [shape: f32[1,32], index: 6, kind: input, shape index: {}]   ;;  %s3747_s7 = inlined_call_operand.hbm [shape: f32[2,8,32], index: 7, kind: output, shape index: {}]  }
   0x1   :  { %14 = vsyncpa [#allocation7 + $0x1], 0 }
   0x2   :  { %15 = vsyncpa [#allocation10], 0 }
   0x3   :  { %16 = vsyncpa [#allocation13], 0 }
   0x4   :  { %17 = vsyncpa [#allocation8], 0 }
   0x5   :  { %19 = vsyncpa [#allocation8 + $0x1], 0  ;;  %s3183_s24 = smov 0   ;;  %s3185_s25 = smov 0  }
   0x6   :  { %s3187_s26 = smov 0   ;;  %s3189_s27 = smov 0  }
   0x7 LB: > { %s3122_s28 = smov [#allocation9]   ;;  %s3204_s30 = sadd.s32 4294967295, %s3120_s27   ;;  %s3120_s27 = sphi %s3189_s27, %s3771_s27   ;;  %s3116_s26 = sphi %s3187_s26, %s3770_s26   ;;  %s3112_s25 = sphi %s3185_s25, %s3769_s25   ;;  %s3108_s24 = sphi %s3183_s24, %s3768_s24  }
   0x8   : > { %s220_s29 = sshll.u32 %s3122_s28, 4  ;;  %p2321_p0 = scmp.ge.s32.totalorder %s3120_s27, 1  ;;  %s3209_s29 = int_to_ptr.vmem [resolvable:$true] %s220_s29 }
   0x9   : > { %p3748_p1 = scmp.eq.s32.totalorder %s3204_s30, 0  ;;  %p208_p2 = scmp.lt.s32.totalorder %s3120_s27, 3 }
   0xa   : > { %s3123_s10 = smov [#allocation12]   ;;  %s3124_s12 = smov [#allocation11]  }
   0xb   : > { %p3211_p3 = pnand %p2321_p0, %p208_p2  ;;  %s249_s11 = sshll.u32 %s3123_s10, 4  ;;  %s3224_s11 = int_to_ptr.vmem [resolvable:$true] %s249_s11 }
   0xc   : > { %s3226_s13 = sshll.u32 %s3124_s12, 4  ;;  %s2904_s16 = scalar_lea.hbm %s3741_s1, 1536  ;;  %s237_s13 = int_to_ptr.vmem [resolvable:$true] %s3226_s13 }
   0xd   : > { %s3751_s8 = scalar_select %p3211_p3, 1, 0 }
   0xe   : > { %p2796_p5 = pneg %p3211_p3  ;;  %p2905_p7 = scmp.ne.s32.totalorder %s3741_s1, %s2904_s16 }
   0xf   : > { %p2911_p11 = scmp.lt.u32.totalorder %s2904_s16, %s3741_s1 }
  0x10   : > { %p3220_p6 = pnand %p2796_p5, %p3748_p1 }
  0x12   : > { %p3236_p8 = pneg %p3220_p6 }
  0x14   : > { %p2907_p9 = pnand %p3236_p8, %p2905_p7 }
  0x16   : > { %p2908_p10 = pneg %p2907_p9 }
  0x18   : > { %p2913_p12 = pnand %p2911_p11, %p2908_p10 }
  0x1a   : > { %2916 = shalt.err (!%p2913_p12)
}
  0x1b   : > { %s2917_s22 = scalar_lea.vmem %s3209_s29, 1536  ;;  %p2925_p5 = scmp.lt.s32.totalorder %s3209_s29, %s3209_s29 }
  0x1c   : > { %p2918_p13 = scmp.ne.s32.totalorder %s3209_s29, %s2917_s22  ;;  %p2926_p4 = scmp.lt.s32.totalorder %s2917_s22, %s2917_s22 }
  0x1e   : > { %p2920_p0 = pnand %p2918_p13, %p3236_p8  ;;  %p2927_p7 = por %p2926_p4, %p2925_p5 }
  0x20   : > { %p2921_p2 = pneg %p2920_p0 }
  0x22   : > { %p2928_p9 = pnand %p2927_p7, %p2921_p2 }
  0x24   : > { %2931 = shalt.err (!%p2928_p9)
}
  0x25   : > { %s3125_s23 = smov 384   ;;  %s3126_s28 = smov 24  }
  0x26   : > { %2799 = dma.hbm_to_vmem [thread:$0]  (!%p3220_p6), %s3741_s1, 1536, %s3209_s29, [#allocation10], %s3125_s23, %s3125_s23, %s3126_s28  }
  0x27   : > { %s2932_s16 = scalar_lea.hbm %s3744_s4, 2048 }
  0x28   : > { %p2933_p4 = scmp.ne.s32.totalorder %s3744_s4, %s2932_s16  ;;  %p2939_p12 = scmp.lt.u32.totalorder %s2932_s16, %s3744_s4 }
  0x2a   : > { %p2935_p10 = pnand %p2933_p4, %p3236_p8 }
  0x2c   : > { %p2936_p11 = pneg %p2935_p10 }
  0x2e   : > { %p2941_p13 = pnand %p2939_p12, %p2936_p11 }
  0x30   : > { %2944 = shalt.err (!%p2941_p13)
}
  0x31   : > { %s2945_s29 = scalar_lea.vmem %s3224_s11, 2048  ;;  %p2953_p7 = scmp.lt.s32.totalorder %s3224_s11, %s3224_s11 }
  0x32   : > { %p2946_p0 = scmp.ne.s32.totalorder %s3224_s11, %s2945_s29  ;;  %p2954_p9 = scmp.lt.s32.totalorder %s2945_s29, %s2945_s29 }
  0x34   : > { %p2948_p2 = pnand %p2946_p0, %p3236_p8  ;;  %p2955_p4 = por %p2954_p9, %p2953_p7 }
  0x36   : > { %p2949_p5 = pneg %p2948_p2 }
  0x38   : > { %p2956_p10 = pnand %p2955_p4, %p2949_p5 }
  0x3a   : > { %2959 = shalt.err (!%p2956_p10)
}
  0x3b   : > { %s3127_s22 = smov 128   ;;  %s3128_s23 = smov 8  }
  0x3c   : > { %2805 = dma.hbm_to_vmem [thread:$0]  (!%p3220_p6), %s3744_s4, 2048, %s3224_s11, [#allocation13], %s3127_s22, %s3127_s22, %s3128_s23  }
  0x3d   : > { %s2960_s15 = scalar_lea.hbm %s3743_s3, 2048 }
  0x3e   : > { %p2961_p11 = scmp.ne.s32.totalorder %s3743_s3, %s2960_s15  ;;  %p2967_p0 = scmp.lt.u32.totalorder %s2960_s15, %s3743_s3 }
  0x40   : > { %p2963_p12 = pnand %p2961_p11, %p3236_p8 }
  0x42   : > { %p2964_p13 = pneg %p2963_p12 }
  0x44   : > { %p2969_p2 = pnand %p2967_p0, %p2964_p13 }
  0x46   : > { %2972 = shalt.err (!%p2969_p2)
}
  0x47   : > { %s2973_s21 = scalar_lea.vmem %s237_s13, 2048  ;;  %p2981_p4 = scmp.lt.s32.totalorder %s237_s13, %s237_s13 }
  0x48   : > { %p2974_p5 = scmp.ne.s32.totalorder %s237_s13, %s2973_s21  ;;  %p2982_p10 = scmp.lt.s32.totalorder %s2973_s21, %s2973_s21 }
  0x4a   : > { %p2976_p7 = pnand %p2974_p5, %p3236_p8  ;;  %p2983_p1 = por %p2982_p10, %p2981_p4 }
  0x4c   : > { %p2977_p9 = pneg %p2976_p7 }
  0x4e   : > { %p2984_p3 = pnand %p2983_p1, %p2977_p9 }
  0x50   : > { %2987 = shalt.err (!%p2984_p3)
}
  0x51   : > { %2802 = dma.hbm_to_vmem [thread:$0]  (!%p3220_p6), %s3743_s3, 2048, %s237_s13, [#allocation10], %s3127_s22, %s3127_s22, %s3128_s23  }
  0x52   : > { %s3129_s28 = smov [#allocation14]   ;;  %s2988_s15 = scalar_lea.hbm %s3745_s5, 512 }
  0x53   : > { %s262_s10 = sshll.u32 %s3129_s28, 4  ;;  %p2989_p1 = scmp.ne.s32.totalorder %s3745_s5, %s2988_s15  ;;  %s263_s10 = int_to_ptr.vmem [resolvable:$true] %s262_s10 }
  0x54   : > { %p2995_p12 = scmp.lt.u32.totalorder %s2988_s15, %s3745_s5 }
  0x55   : > { %p2991_p3 = pnand %p2989_p1, %p3236_p8 }
  0x57   : > { %p2992_p11 = pneg %p2991_p3 }
  0x59   : > { %p2997_p13 = pnand %p2995_p12, %p2992_p11 }
  0x5b   : > { %3000 = shalt.err (!%p2997_p13)
}
  0x5c   : > { %s3001_s13 = scalar_lea.vmem %s263_s10, 512  ;;  %p3009_p7 = scmp.lt.s32.totalorder %s263_s10, %s263_s10 }
  0x5d   : > { %p3002_p0 = scmp.ne.s32.totalorder %s263_s10, %s3001_s13  ;;  %p3010_p9 = scmp.lt.s32.totalorder %s3001_s13, %s3001_s13 }
  0x5f   : > { %p3004_p2 = pnand %p3002_p0, %p3236_p8  ;;  %p3011_p4 = por %p3010_p9, %p3009_p7 }
  0x61   : > { %p3005_p5 = pneg %p3004_p2 }
  0x63   : > { %p3012_p10 = pnand %p3011_p4, %p3005_p5 }
  0x65   : > { %3015 = shalt.err (!%p3012_p10)
}
  0x66   : > { %2808 = dma.hbm_to_vmem [thread:$0]  (!%p3220_p6), %s3745_s5, 512, %s263_s10, [#allocation13], %s3127_s22, %s3127_s22, %s3128_s23  }
  0x67   : > { %s2320_s9 = sadd.s32 4294967294, %s3120_s27   ;;  %s3328_s19 = sadd.s32 1, %s3120_s27  }
  0x68   : > { %s29_s29 = ssub.s32 %s3120_s27, %s3328_s19  ;;  %s32_s28 = sadd.s32 1, %s3116_s26 }
  0x69   : > { %p30_p8 = scmp.eq.s32.totalorder %s29_s29, 0  ;;  %p39_p1 = scmp.ne.s32.totalorder %s3116_s26, %s3112_s25 }
  0x6a   : > { %p40_p3 = scmp.eq.s32.totalorder %s3120_s27, 0  ;;  %p45_p11 = scmp.ne.s32.totalorder %s3112_s25, %s3108_s24 }
  0x6b   : > { %s3339_s12 = scalar_select %p30_p8, %s3116_s26, %s32_s28  }
  0x6c   : > { %p3341_p12 = por %p40_p3, %p39_p1  ;;  %p3755_p13 = scmp.eq.s32.totalorder %s3204_s30, 0 }
  0x6d   : > { %p195_p0 = scmp.eq.s32.totalorder %s3204_s30, 1  ;;  %p201_p2 = scmp.eq.s32.totalorder %s2320_s9, 1 }
  0x6e   : > { %p3347_p6 = por %p3755_p13, %p45_p11  ;;  %p2821_p5 = scmp.lt.s32.totalorder %s3120_s27, 2 }
  0x6f   : > { %s279_s23 = sand.u32 1, %s3116_s26   ;;  %p3354_p7 = por %p195_p0, %p39_p1 }
  0x70   : > { %p3358_p9 = por %p201_p2, %p45_p11  ;;  %s2327_s16 = sshll.u32 %s279_s23, 3 }
  0x71   : > { %s3757_s10 = scalar_select %p3354_p7, 1, 0 }
  0x72   : > { %s3758_s15 = scalar_select %p3358_p9, 1, 0 }
  0x73   : > { %s2328_s17 = sshll.u32 %s3120_s27, 7  ;;  %s283_s21 = scalar_lea.vmem [#allocation6], %s2327_s16 }
  0x74   : > { %s3366_s13 = scalar_lea.hbm %s3740_s0, %s2328_s17  ;;  %s290_s11 = sshll.u32 %s283_s21, 4  ;;  %s3368_s11 = int_to_ptr.vmem [resolvable:$true] %s290_s11 }
  0x75   : > { %p3372_p4 = pnand %p2821_p5, %p3341_p12  ;;  %s280_s29 = scalar_lea.sflag [#allocation7], %s279_s23 }
  0x76   : > { %s3016_s28 = scalar_lea.hbm %s3366_s13, 128  ;;  %s3021_s18 = scalar_lea.hbm %s3740_s0, 256 }
  0x77   : > { %p3017_p10 = scmp.ne.s32.totalorder %s3366_s13, %s3016_s28  ;;  %p3018_p8 = pneg %p3372_p4 }
  0x78   : > { %p3022_p11 = scmp.lt.u32.totalorder %s3366_s13, %s3740_s0  ;;  %p3023_p12 = scmp.lt.u32.totalorder %s3021_s18, %s3016_s28 }
  0x79   : > { %p3019_p1 = pnand %p3018_p8, %p3017_p10  ;;  %p3025_p0 = scmp.lt.u32.totalorder %s3016_s28, %s3366_s13 }
  0x7a   : > { %p3024_p13 = por %p3023_p12, %p3022_p11 }
  0x7b   : > { %p3020_p3 = pneg %p3019_p1 }
  0x7c   : > { %p3026_p2 = por %p3025_p0, %p3024_p13 }
  0x7e   : > { %p3027_p5 = pnand %p3026_p2, %p3020_p3 }
  0x80   : > { %3030 = shalt.err (!%p3027_p5)
}
  0x81   : > { %s3031_s23 = scalar_lea.vmem %s3368_s11, 128  ;;  %s3130_s21 = smov [#allocation6]  }
  0x82   : > { %p3032_p10 = scmp.ne.s32.totalorder %s3368_s11, %s3031_s23  ;;  %s3036_s16 = sshll.u32 %s3130_s21, 4  ;;  %s3037_s16 = int_to_ptr.vmem [resolvable:$false] %s3036_s16 }
  0x83   : > { %s3038_s17 = scalar_lea.vmem %s3037_s16, 256  ;;  %p3039_p7 = scmp.lt.s32.totalorder %s3368_s11, %s3037_s16 }
  0x84   : > { %p3034_p1 = pnand %p3032_p10, %p3018_p8  ;;  %p3040_p11 = scmp.lt.s32.totalorder %s3038_s17, %s3031_s23 }
  0x86   : > { %p3035_p9 = pneg %p3034_p1  ;;  %p3041_p12 = por %p3040_p11, %p3039_p7 }
  0x88   : > { %p3042_p13 = pnand %p3041_p12, %p3035_p9 }
  0x8a   : > { %3045 = shalt.err (!%p3042_p13)
}
  0x8b   : > { %2812 = dma.hbm_to_vmem [thread:$0]  (!%p3372_p4), %s3366_s13, 128, %s3368_s11, %s280_s29  }
  0x8c   : > { %p3760_p3 = scmp.ne.s32.totalorder %s3751_s8, 0 }
  0x8d   : > { %s3404_s28 = sand.u32 (!%p3760_p3), 1, %s3112_s25  }
  0x8e   : > { %299 = sbr.rel (%p3760_p3) target bundleno = 2125 (0x84d), region = 48  ;;  %s2330_s18 = sshll.u32 (!%p3760_p3), %s3404_s28, 3 }
  0x8f   : > { %s302_s14 = scalar_lea.sflag (!%p3760_p3), [#allocation7], %s3404_s28  ;;  %s305_s20 = scalar_lea.vmem (!%p3760_p3), [#allocation6], %s2330_s18 }
  0x95   : > { %3091 = dma.done.wait (%p3347_p6), %s302_s14, 128  }
  0x96   : > { %3093 = vsyncadd (%p3347_p6), %s302_s14, 4294967168  ;;  %p3761_p7 = scmp.eq.s32.totalorder %s3204_s30, 0 }
  0x98   : > { %3095 = dma.done.wait (%p3761_p7), [#allocation10], 3584   ;;  %p3762_p9 = pmov %p3761_p7 }
  0x99   : > { %p3763_p4 = pmov %p3761_p7 }
  0x9a   : > { %3097 = vsyncadd (%p3762_p9), [#allocation10], 4294963712 }
  0x9b   : > { %3099 = dma.done.wait (%p3763_p4), [#allocation13], 2560   ;;  %p3764_p8 = pmov %p3763_p4 }
  0x9c   : > { %v3131_v0 = vmov 0.0   ;;  %v3132_v1 = vmov 0.0|0.0   ;;  %v354_v2 = vld [vmem:[#allocation9 + $0x8] sm:$0xff]  ;;  %v357_v3 = vld [vmem:[#allocation9 + $0x20] sm:$0xff]  ;;  %v356_v6 = vld [vmem:[#allocation9 + $0x18] sm:$0xff]  ;;  %vm382_vm0 = vcmask 261120  }
  0x9d   : > { %3101 = vsyncadd (%p3764_p8), [#allocation13], 4294964736  ;;  %450 = vmatprep.mubr.f32.mxu0 %v3131_v0  ;;  %2668 = vmatprep.subr.bf16.mxu1 %v3132_v1  ;;  %v353_v4 = vld [vmem:[#allocation9] sm:$0xff]  ;;  %v2660_v5 = vpack.c.bf16 %v357_v3, %v354_v2  ;;  %v360_v7 = vld [vmem:[#allocation9 + $0x38] sm:$0xff]  ;;  %vm3133_vm1 = vmmov 0   ;;  %s3134_s13 = smov 120  }
  0x9e   : > { %v363_v8 = vld [vmem:[#allocation9 + $0x50] sm:$0xff]  ;;  %v2662_v9 = vpack.c.bf16 %v356_v6, %v353_v4  ;;  %v362_v12 = vld [vmem:[#allocation9 + $0x48] sm:$0xff]  ;;  %v528_v14 = vld [vmem:[#allocation11] sm:$0xff]  ;;  %2466 = vmatprep.mubr.msk.f32.mxu1 %vm3133_vm1, %v3131_v0  ;;  %s3135_s11 = smov 104   ;;  %s3136_s9 = smov 112   ;;  %vm991_vm2 = vcmask 64512  }
  0x9f   : > { %v2664_v10 = vpack.c.bf16 %v363_v8, %v360_v7  ;;  %v359_v11 = vld [vmem:[#allocation9 + $0x30] sm:$0xff]  ;;  %2661 = vmatprep.subr.bf16.mxu0 %v2660_v5  ;;  %v529_v15 = vld [vmem:[#allocation11 + $0x8] sm:$0xff]  ;;  %v531_v19 = vld [vmem:[#allocation11 + $0x18] sm:$0xff]  ;;  %v367_v7 = vlaneseq  ;;  %s3139_s29 = smov 16   ;;  %s3140_s23 = smov 8   ;;  %vm2109_vm3 = vcmask 130048  }
  0xa0   : > { %2663 = vmatpush1.bf16.msra.mxu0 %v2662_v9  ;;  %v2666_v13 = vpack.c.bf16 %v362_v12, %v359_v11  ;;  %v352_v16 = vld [vmem:[%s305_s20] sm:$0xff]  ;;  %v3424_v17 = vpack.c.bf16 %v529_v15, %v528_v14  ;;  %v532_v21 = vld [vmem:[#allocation11 + $0x20] sm:$0xff]  ;;  %v533_v22 = vld [vmem:[#allocation11 + $0x28] sm:$0xff]  ;;  %s3141_s21 = smov 24   ;;  %vm2111_vm4 = vcmask 195584   ;;  %s2361_s14 = sshll.u32 %s3204_s30, 7 }
  0xa1   : > { %2665 = vmatprep.subr.bf16.mxu0 %v2664_v10  ;;  %v530_v18 = vld [vmem:[#allocation11 + $0x10] sm:$0xff]  ;;  %v3433_v23 = vpack.c.bf16 %v533_v22, %v532_v21  ;;  %v535_v25 = vld [vmem:[#allocation11 + $0x38] sm:$0xff]  ;;  %v536_v27 = vld [vmem:[#allocation11 + $0x40] sm:$0xff]  ;;  %v3490_v8 = vshrl.u32 %v367_v7, 7  ;;  %s351_s20 = scalar_lea.vmem [#allocation15], %s2330_s18  ;;  %p3765_p0 = scmp.ne.s32.totalorder %s3757_s10, 0 }
  0xa2   : > { %v3429_v20 = vpack.c.bf16 %v531_v19, %v530_v18  ;;  %v534_v24 = vld [vmem:[#allocation11 + $0x30] sm:$0xff]  ;;  %v537_v28 = vld [vmem:[#allocation11 + $0x48] sm:$0xff]  ;;  %v539_v31 = vld [vmem:[#allocation11 + $0x58] sm:$0xff]  ;;  %s2212_s8 = sshll.u32 %s351_s20, 4  ;;  %s3142_s18 = smov [#allocation15]   ;;  %s3697_s8 = int_to_ptr.vmem [resolvable:$true] %s2212_s8 }
  0xa3   : > { %v3437_v26 = vpack.c.bf16 %v535_v25, %v534_v24  ;;  %v3441_v29 = vpack.c.bf16 %v537_v28, %v536_v27  ;;  %v538_v30 = vld [vmem:[#allocation11 + $0x50] sm:$0xff]  ;;  %v540_v33 = vld [vmem:[#allocation11 + $0x60] sm:$0xff]  ;;  %v541_v34 = vld [vmem:[#allocation11 + $0x68] sm:$0xff]  ;;  %v369_v9 = vsub.s32 0, %v3490_v8  ;;  %s3046_s30 = scalar_lea.vmem %s3697_s8, 128 }
  0xa4   : > { %2667 = vmatpush1.bf16.msra.mxu0 %v2666_v13  ;;  %v3445_v32 = vpack.c.bf16 %v539_v31, %v538_v30  ;;  %v3449_v35 = vpack.c.bf16 %v541_v34, %v540_v33  ;;  %v542_v36 = vld [vmem:[#allocation11 + $0x70] sm:$0xff]  ;;  %v543_v37 = vld [vmem:[#allocation11 + $0x78] sm:$0xff]  ;;  %v358_v40 = vld [vmem:[#allocation9 + $0x28] sm:$0xff]  ;;  %p3047_p6 = scmp.ne.s32.totalorder %s3697_s8, %s3046_s30 }
  0xa5   : > { %2674 = vmatprep.subr.bf16.mxu0 %v3132_v1  ;;  %v3454_v38 = vpack.c.bf16 %v543_v37, %v542_v36  ;;  %v355_v39 = vld [vmem:[#allocation9 + $0x10] sm:$0xff]  ;;  %v361_v41 = vld [vmem:[#allocation9 + $0x40] sm:$0xff]  ;;  %v364_v43 = vld [vmem:[#allocation9 + $0x58] sm:$0xff]  ;;  %v3137_v36 = vmov 1983009808  }
  0xa6   : > { %v2669_v42 = vpack.c.bf16 %v358_v40, %v355_v39  ;;  %v2672_v44 = vpack.c.bf16 %v364_v43, %v361_v41  ;;  %v614_v45 = vld [vmem:[#allocation12] sm:$0xff]  ;;  %v615_v46 = vld [vmem:[#allocation12 + $0x8] sm:$0xff]  ;;  %v616_v48 = vld [vmem:[#allocation12 + $0x10] sm:$0xff]  ;;  %v858_v37 = vunpack.c.l.s4 %v3137_v36  ;;  %v3138_v39 = vmov 1934713408   ;;  %p3048_p2 = pnand %p3047_p6, %p3765_p0 }
  0xa7   : > { %2336 = vmatmul.mubr.msk.f32.vlgmr.msra.gmra.mrb[0].mxu0 %vm382_vm0, %v352_v16  ;;  %v3463_v47 = vpack.c.bf16 %v615_v46, %v614_v45  ;;  %v617_v49 = vld [vmem:[#allocation12 + $0x18] sm:$0xff]  ;;  %v618_v51 = vld [vmem:[#allocation12 + $0x20] sm:$0xff]  ;;  %v619_v52 = vld [vmem:[#allocation12 + $0x28] sm:$0xff]  ;;  %v890_v40 = vunpack.c.l.s4 %v3138_v39 }
  0xa8   : > { %2676 = vmatpush3.bf16.msra.mxu0 %v3424_v17  ;;  %2501 = vmatprep.mubr.msk.f32.mxu0 %vm3133_vm1, %v3131_v0  ;;  %v3468_v50 = vpack.c.bf16 %v617_v49, %v616_v48  ;;  %v3474_v53 = vpack.c.bf16 %v619_v52, %v618_v51  ;;  %v620_v54 = vld [vmem:[#allocation12 + $0x30] sm:$0xff]  ;;  %v621_v55 = vld [vmem:[#allocation12 + $0x38] sm:$0xff]  ;;  %v622_v57 = vld [vmem:[#allocation12 + $0x40] sm:$0xff]  ;;  %v859_v41 = vunpack.c.0.s8 %v858_v37  ;;  %p3049_p5 = pneg %p3048_p2 }
  0xa9   : > { %2677 = vmatprep.subr.bf16.mxu0 %v3132_v1  ;;  %2670 = vmatpush3.bf16.msra.mxu1 %v2669_v42  ;;  %v3478_v56 = vpack.c.bf16 %v621_v55, %v620_v54  ;;  %v623_v58 = vld [vmem:[#allocation12 + $0x48] sm:$0xff]  ;;  %v624_v60 = vld [vmem:[#allocation12 + $0x50] sm:$0xff]  ;;  %v625_v61 = vld [vmem:[#allocation12 + $0x58] sm:$0xff] }
  0xaa   : > { %2671 = vmatprep.subr.bf16.mxu1 %v3132_v1  ;;  %v3482_v59 = vpack.c.bf16 %v623_v58, %v622_v57  ;;  %v2714_v62 = vpack.c.bf16 %v625_v61, %v624_v60  ;;  %v626_v63 = vld [vmem:[#allocation12 + $0x60] sm:$0xff]  ;;  %v627_v2 = vld [vmem:[#allocation12 + $0x68] sm:$0xff]  ;;  %v628_v4 = vld [vmem:[#allocation12 + $0x70] sm:$0xff]  ;;  %v3547_v45 = vsub.s32 %v859_v41, %v3490_v8 }
  0xab   : > { %v2717_v3 = vpack.c.bf16 %v627_v2, %v626_v63  ;;  %v629_v5 = vld [vmem:[#allocation12 + $0x78] sm:$0xff]  ;;  %v3496_v10 = vld [vmem:[%s3742_s2] sm:$0x7] }
  0xac   : > { %2679 = vmatpush3.bf16.msra.mxu0 %v3429_v20  ;;  %v2720_v6 = vpack.c.bf16 %v629_v5, %v628_v4  ;;  %v370_v11 = vrot.slane %v3496_v10, %v369_v9 }
  0xad   : > { %2680 = vmatprep.subr.bf16.mxu0 %v3132_v1  ;;  %2673 = vmatpush3.bf16.msra.mxu1 %v2672_v44  ;;  %v891_v44 = vunpack.c.0.s8 %v890_v40 }
  0xae   : > { %2698 = vmatprep.subr.bf16.mxu1 %v3132_v1 }
  0xaf   : > { %v3550_v52 = vsub.s32 %v891_v44, %v3490_v8 }
  0xb0   : > { %2682 = vmatpush3.bf16.msra.mxu0 %v3433_v23  ;;  %2467 = vmatmul.mubr.msk.f32.vlgmr.msra.gmra.mrb[0].mxu1 %vm382_vm0, %v352_v16  ;;  %v373_v16 = vsub.s32 1, %v3490_v8 }
  0xb1   : > { %2683 = vmatprep.subr.bf16.mxu0 %v3132_v1  ;;  %2700 = vmatpush3.bf16.msra.mxu1 %v3463_v47 }
  0xb2   : > { %2536 = vmatprep.mubr.msk.f32.mxu1 %vm3133_vm1, %v3131_v0  ;;  %2701 = vmatprep.subr.bf16.mxu1 %v3132_v1 }
  0xb4   : > { %2685 = vmatpush3.bf16.msra.mxu0 %v3437_v26 }
  0xb5   : > { %2686 = vmatprep.subr.bf16.mxu0 %v3132_v1  ;;  %2703 = vmatpush3.bf16.msra.mxu1 %v3468_v50 }
  0xb6   : > { %2704 = vmatprep.subr.bf16.mxu1 %v3132_v1 }
  0xb8   : > { %2688 = vmatpush3.bf16.msra.mxu0 %v3441_v29 }
  0xb9   : > { %2689 = vmatprep.subr.bf16.mxu0 %v3132_v1  ;;  %2706 = vmatpush3.bf16.msra.mxu1 %v3474_v53 }
  0xba   : > { %2707 = vmatprep.subr.bf16.mxu1 %v3132_v1 }
  0xbc   : > { %2691 = vmatpush3.bf16.msra.mxu0 %v3445_v32 }
  0xbd   : > { %2692 = vmatprep.subr.bf16.mxu0 %v3132_v1  ;;  %2709 = vmatpush3.bf16.msra.mxu1 %v3478_v56 }
  0xbe   : > { %2710 = vmatprep.subr.bf16.mxu1 %v3132_v1 }
  0xc0   : > { %2694 = vmatpush3.bf16.msra.mxu0 %v3449_v35 }
  0xc1   : > { %2695 = vmatprep.subr.bf16.mxu0 %v3132_v1  ;;  %2712 = vmatpush3.bf16.msra.mxu1 %v3482_v59 }
  0xc2   : > { %2713 = vmatprep.subr.bf16.mxu1 %v3132_v1 }
  0xc4   : > { %2697 = vmatpush3.bf16.msra.mxu0 %v3454_v38 }
  0xc5   : > { %2722 = vmatprep.subr.bf16.mxu0 %v3132_v1  ;;  %2715 = vmatpush3.bf16.msra.mxu1 %v2714_v62 }
  0xc6   : > { %2716 = vmatprep.subr.bf16.mxu1 %v3132_v1 }
  0xc9   : > { %2718 = vmatpush3.bf16.msra.mxu1 %v2717_v3 }
  0xca   : > { %2719 = vmatprep.subr.bf16.mxu1 %v3132_v1 }
  0xcd   : > { %2721 = vmatpush3.bf16.msra.mxu1 %v2720_v6 }
  0xce   : > { %2746 = vmatprep.subr.bf16.mxu1 %v3132_v1 }
 0x17a   : > { %v452_v12 = vpop.f32.mrb[0].mxu0 }
 0x17b   : > { %v453_v13 = vadd.f32 %v452_v12, %v370_v11  ;;  %v454_v14 = vpop.f32.mrb[1].mxu0 }
 0x17d   : > { %v527_v15 = vmul.f32 %v453_v13, %v453_v13 }
 0x17f   : > { %2502 = vmatmul.mubr.f32.vlgmr.msra.gmra.mrb[2].mxu0 %v527_v15 }
 0x180   : > { %2724 = vmatpush3.bf16.msra.mxu0 %v3424_v17  ;;  %2571 = vmatprep.mubr.msk.f32.mxu0 %vm3133_vm1, %v3131_v0  ;;  %v374_v17 = vrot.slane %v3496_v10, %v373_v16 }
 0x181   : > { %2725 = vmatprep.subr.bf16.mxu0 %v3132_v1 }
 0x182   : > { %v455_v18 = vadd.f32 %v454_v14, %v374_v17 }
 0x184   : > { %2727 = vmatpush3.bf16.msra.mxu0 %v3429_v20  ;;  %v702_v19 = vmul.f32 %v455_v18, %v455_v18  ;;  %v3521_v20 = vpop.f32.mrb[0].mxu1 }
 0x185   : > { %2728 = vmatprep.subr.bf16.mxu0 %v3132_v1  ;;  %v2468_v21 = vpop.f32.mrb[1].mxu1 }
 0x188   : > { %2730 = vmatpush3.bf16.msra.mxu0 %v3433_v23 }
 0x189   : > { %2731 = vmatprep.subr.bf16.mxu0 %v3132_v1 }
 0x18c   : > { %2733 = vmatpush3.bf16.msra.mxu0 %v3437_v26 }
 0x18d   : > { %2734 = vmatprep.subr.bf16.mxu0 %v3132_v1 }
 0x190   : > { %2736 = vmatpush3.bf16.msra.mxu0 %v3441_v29 }
 0x191   : > { %2737 = vmatprep.subr.bf16.mxu0 %v3132_v1 }
 0x194   : > { %2739 = vmatpush3.bf16.msra.mxu0 %v3445_v32 }
 0x195   : > { %2740 = vmatprep.subr.bf16.mxu0 %v3132_v1 }
 0x198   : > { %2742 = vmatpush3.bf16.msra.mxu0 %v3449_v35 }
 0x199   : > { %2743 = vmatprep.subr.bf16.mxu0 %v3132_v1 }
 0x19c   : > { %2745 = vmatpush3.bf16.msra.mxu0 %v3454_v38 }
 0x19d   : > { %2619 = vmatprep.subr.mxu0 %v3131_v0 }
 0x19f   : > { %2572 = vmatmul.mubr.f32.vlgmr.msra.gmra.mrb[4].mxu0 %v702_v19 }
 0x1a0   : > { %2621 = vmatprep.mubr.msk.f32.mxu0 %vm3133_vm1, %v3131_v0 }
 0x252   : > { %v610_v22 = vpop.f32.mrb[2].mxu0 }
 0x253   : > { %v2503_v23 = vpop.f32.mrb[3].mxu0  ;;  %2537 = vmatmul.mubr.f32.vlgmr.msra.gmra.mrb[2].mxu1 %v610_v22 }
 0x254   : > { %2748 = vmatpush3.bf16.msra.mxu1 %v3463_v47  ;;  %2606 = vmatprep.mubr.msk.f32.mxu1 %vm3133_vm1, %v3131_v0 }
 0x255   : > { %2749 = vmatprep.subr.bf16.mxu1 %v3132_v1 }
 0x258   : > { %2751 = vmatpush3.bf16.msra.mxu1 %v3468_v50 }
 0x259   : > { %2752 = vmatprep.subr.bf16.mxu1 %v3132_v1 }
 0x25c   : > { %2754 = vmatpush3.bf16.msra.mxu1 %v3474_v53 }
 0x25d   : > { %2755 = vmatprep.subr.bf16.mxu1 %v3132_v1 }
 0x260   : > { %2757 = vmatpush3.bf16.msra.mxu1 %v3478_v56 }
 0x261   : > { %2758 = vmatprep.subr.bf16.mxu1 %v3132_v1 }
 0x264   : > { %2760 = vmatpush3.bf16.msra.mxu1 %v3482_v59 }
 0x265   : > { %2761 = vmatprep.subr.bf16.mxu1 %v3132_v1 }
 0x268   : > { %2763 = vmatpush3.bf16.msra.mxu1 %v2714_v62 }
 0x269   : > { %2764 = vmatprep.subr.bf16.mxu1 %v3132_v1 }
 0x26c   : > { %2766 = vmatpush3.bf16.msra.mxu1 %v2717_v3 }
 0x26d   : > { %2767 = vmatprep.subr.bf16.mxu1 %v3132_v1 }
 0x270   : > { %2769 = vmatpush3.bf16.msra.mxu1 %v2720_v6 }
 0x271   : > { %2609 = vmatprep.subr.mxu1 %v3131_v0 }
 0x272   : > { %v769_v24 = vpop.f32.mrb[4].mxu0 }
 0x273   : > { %v2573_v25 = vpop.f32.mrb[5].mxu0  ;;  %2607 = vmatmul.mubr.f32.vlgmr.msra.gmra.mrb[4].mxu1 %v769_v24 }
 0x274   : > { %2611 = vmatprep.mubr.msk.f32.mxu1 %vm3133_vm1, %v3131_v0 }
 0x326   : > { %v696_v26 = vpop.f32.mrb[2].mxu1 }
 0x327   : > { %v697_v27 = vadd.f32 1e-12, %v696_v26  ;;  %v2538_v28 = vpop.f32.mrb[3].mxu1 }
 0x329   : > { %2884 = vrsqrt.f32 %v697_v27 }
 0x333   : > { %v2885_v29 = vpop.eup %2884 }
 0x334   : > { %v701_v30 = vmul.f32 %v2885_v29, %v453_v13 }
 0x336   : > { %846 = vrot.lane.b32.xlu1 %v701_v30, %s3134_s13 }
 0x346   : > { %v839_v31 = vpop.f32.mrb[4].mxu1 }
 0x347   : > { %v840_v32 = vadd.f32 1e-12, %v839_v31  ;;  %v2608_v33 = vpop.f32.mrb[5].mxu1 }
 0x349   : > { %2886 = vrsqrt.f32 %v840_v32 }
 0x353   : > { %v2887_v34 = vpop.eup %2886 }
 0x354   : > { %v844_v35 = vmul.f32 %v2887_v34, %v455_v18 }
 0x356   : > { %1003 = vrot.lane.b32.xlu1 %v844_v35, %s3135_s11  ;;  %997 = vrot.lane.b32.xlu0 %v844_v35, %s3134_s13 }
 0x35a   : > { %852 = vrot.lane.b32.xlu1 %v701_v30, %s3135_s11  ;;  %1000 = vrot.lane.b32.xlu0 %v844_v35, %s3136_s9 }
 0x35e   : > { %849 = vrot.lane.b32.xlu0 %v701_v30, %s3136_s9 }
 0x3a8   : > { %v847_v38 = vpop.permute.xlu1 %846 }
 0x3c8   : > { %v1004_v42 = vpop.permute.xlu1 %1003  ;;  %v998_v43 = vpop.permute.xlu0 %997 }
 0x3c9   : > { %v1022_v46 = vcombine.low %v998_v43, %v1004_v42  ;;  %v1023_v47 = vcombine.high %v998_v43, %v1004_v42 }
 0x3cb   : > { %v1030_v53 = vrot.slane %v1022_v46, %v3547_v45  ;;  %v1037_v54 = vrot.slane %v1023_v47, %v3547_v45 }
 0x3cc   : > { %v1001_v48 = vpop.permute.xlu0 %1000  ;;  %v853_v49 = vpop.permute.xlu1 %852 }
 0x3cd   : > { %v1006_v50 = vcombine.low %v844_v35, %v1001_v48  ;;  %v1007_v51 = vcombine.high %v844_v35, %v1001_v48  ;;  %v871_v57 = vcombine.low %v847_v38, %v853_v49  ;;  %v872_v58 = vcombine.high %v847_v38, %v853_v49 }
 0x3cf   : > { %v1014_v55 = vrot.slane %v1006_v50, %v3547_v45  ;;  %v1021_v56 = vrot.slane %v1007_v51, %v3547_v45  ;;  %v879_v9 = vrot.slane %v871_v57, %v3547_v45  ;;  %v886_v11 = vrot.slane %v872_v58, %v3547_v45 }
 0x3d0   : > { %v850_v59 = vpop.permute.xlu0 %849 }
 0x3d1   : > { %v1038_v60 = vcombine.low %v1014_v55, %v1030_v53  ;;  %v1039_v61 = vcombine.high %v1014_v55, %v1030_v53  ;;  %v1054_v62 = vcombine.low %v1021_v56, %v1037_v54  ;;  %v1055_v63 = vcombine.high %v1021_v56, %v1037_v54 }
 0x3d2   : > { %v855_v2 = vcombine.low %v701_v30, %v850_v59  ;;  %v856_v3 = vcombine.high %v701_v30, %v850_v59 }
 0x3d3   : > { %v1046_v4 = vrot.slane %v1038_v60, %v3550_v52  ;;  %v1053_v5 = vrot.slane %v1039_v61, %v3550_v52  ;;  %v1062_v6 = vrot.slane %v1054_v62, %v3550_v52  ;;  %v1069_v7 = vrot.slane %v1055_v63, %v3550_v52 }
 0x3d4   : > { %v863_v12 = vrot.slane %v855_v2, %v3547_v45  ;;  %v870_v13 = vrot.slane %v856_v3, %v3547_v45 }
 0x3d5   : > { %v1074_v14 = vcombine.low %v1046_v4, %v1053_v5  ;;  %v2340_v15 = vcombine.high %v1046_v4, %v1053_v5  ;;  %v1090_v16 = vcombine.low %v1062_v6, %v1069_v7  ;;  %v2341_v17 = vcombine.high %v1062_v6, %v1069_v7 }
 0x3d6   : > { %v887_v18 = vcombine.low %v863_v12, %v879_v9  ;;  %v888_v19 = vcombine.high %v863_v12, %v879_v9  ;;  %v903_v21 = vcombine.low %v870_v13, %v886_v11  ;;  %v904_v22 = vcombine.high %v870_v13, %v886_v11 }
 0x3d7   : > { %v1081_v23 = vrot.slane %v1074_v14, %v3547_v45  ;;  %v1089_v24 = vrot.slane %v2340_v15, %v3547_v45  ;;  %v1097_v25 = vrot.slane %v1090_v16, %v3547_v45  ;;  %v1105_v26 = vrot.slane %v2341_v17, %v3547_v45 }
 0x3d8   : > { %v895_v27 = vrot.slane %v887_v18, %v3550_v52  ;;  %v902_v28 = vrot.slane %v888_v19, %v3550_v52  ;;  %v911_v29 = vrot.slane %v903_v21, %v3550_v52  ;;  %v918_v30 = vrot.slane %v904_v22, %v3550_v52 }
 0x3d9   : > { %v1106_v31 = vcombine.low %v1081_v23, %v1089_v24  ;;  %v1107_v32 = vcombine.high %v1081_v23, %v1089_v24  ;;  %v1122_v33 = vcombine.low %v1097_v25, %v1105_v26  ;;  %v1123_v34 = vcombine.high %v1097_v25, %v1105_v26 }
 0x3da   : > { %v923_v35 = vcombine.low %v895_v27, %v902_v28  ;;  %v2338_v36 = vcombine.high %v895_v27, %v902_v28  ;;  %v939_v37 = vcombine.low %v911_v29, %v918_v30  ;;  %v2339_v38 = vcombine.high %v911_v29, %v918_v30 }
 0x3db   : > { %v1114_v39 = vrot.slane %v1106_v31, %v3550_v52  ;;  %v1121_v40 = vrot.slane %v1107_v32, %v3550_v52  ;;  %v1130_v41 = vrot.slane %v1122_v33, %v3550_v52  ;;  %v1137_v42 = vrot.slane %v1123_v34, %v3550_v52 }
 0x3dc   : > { %v930_v43 = vrot.slane %v923_v35, %v3547_v45  ;;  %v938_v44 = vrot.slane %v2338_v36, %v3547_v45  ;;  %v946_v46 = vrot.slane %v939_v37, %v3547_v45  ;;  %v954_v47 = vrot.slane %v2339_v38, %v3547_v45 }
 0x3dd   : > { %v1138_v48 = vcombine.low %v1114_v39, %v1130_v41  ;;  %v1139_v49 = vcombine.high %v1114_v39, %v1130_v41  ;;  %v1140_v50 = vcombine.low %v1121_v40, %v1137_v42  ;;  %v1141_v51 = vcombine.high %v1121_v40, %v1137_v42 }
 0x3de   : > { %v955_v53 = vcombine.low %v930_v43, %v938_v44  ;;  %v956_v54 = vcombine.high %v930_v43, %v938_v44  ;;  %v971_v55 = vcombine.low %v946_v46, %v954_v47  ;;  %v972_v56 = vcombine.high %v946_v46, %v954_v47 }
 0x3df   : > { %1142 = vst.msk [vmem:[#allocation3] sm:$0xff] %vm991_vm2, %v1138_v48  ;;  %1143 = vst.msk [vmem:[#allocation3 + $0x8] sm:$0xff] %vm991_vm2, %v1139_v49  ;;  %v377_v30 = vsub.s32 2, %v3490_v8 }
 0x3e0   : > { %1144 = vst.msk [vmem:[#allocation3 + $0x10] sm:$0xff] %vm991_vm2, %v1140_v50  ;;  %1145 = vst.msk [vmem:[#allocation3 + $0x18] sm:$0xff] %vm991_vm2, %v1141_v51  ;;  %v963_v57 = vrot.slane %v955_v53, %v3550_v52  ;;  %v970_v58 = vrot.slane %v956_v54, %v3550_v52  ;;  %v979_v59 = vrot.slane %v971_v55, %v3550_v52 }
 0x3e1   : > { %v986_v60 = vrot.slane %v972_v56, %v3550_v52  ;;  %v378_v31 = vrot.slane %v3496_v10, %v377_v30 }
 0x3e2   : > { %v987_v61 = vcombine.low %v963_v57, %v979_v59  ;;  %v988_v62 = vcombine.high %v963_v57, %v979_v59 }
 0x3e3   : > { %v989_v63 = vcombine.low %v970_v58, %v986_v60  ;;  %v990_v2 = vcombine.high %v970_v58, %v986_v60  ;;  %v524_v32 = vadd.f32 %v3521_v20, %v378_v31 }
 0x3e4   : > { %992 = vst.msk [vmem:[#allocation2] sm:$0xff] %vm991_vm2, %v987_v61  ;;  %993 = vst.msk [vmem:[#allocation2 + $0x8] sm:$0xff] %vm991_vm2, %v988_v62 }
 0x3e5   : > { %994 = vst.msk [vmem:[#allocation2 + $0x10] sm:$0xff] %vm991_vm2, %v989_v63  ;;  %995 = vst.msk [vmem:[#allocation2 + $0x18] sm:$0xff] %vm991_vm2, %v990_v2 }
 0x3e6   : > { %v1300_v3 = vld [vmem:[#allocation3] sm:$0xff]  ;;  %v1301_v7 = vld [vmem:[#allocation3 + $0x8] sm:$0xff] }
 0x3e7   : > { %v1302_v4 = vld [vmem:[#allocation3 + $0x10] sm:$0xff]  ;;  %2610 = vmatpush3.xpose.msk.msra.mxu1 %vm991_vm2, %v1300_v3  ;;  %v1303_v11 = vld [vmem:[#allocation3 + $0x18] sm:$0xff] }
 0x3e8   : > { %2620 = vmatpush3.xpose.msk.msra.mxu0 %vm991_vm2, %v1302_v4  ;;  %2614 = vmatprep.subr.mxu1 %v3131_v0 }
 0x3e9   : > { %2629 = vmatprep.subr.mxu0 %v3131_v0 }
 0x3eb   : > { %v1296_v5 = vld [vmem:[#allocation2] sm:$0xff]  ;;  %v1297_v9 = vld [vmem:[#allocation2 + $0x8] sm:$0xff] }
 0x3ec   : > { %v1298_v6 = vld [vmem:[#allocation2 + $0x10] sm:$0xff]  ;;  %2612 = vmatmul.mubr.msk.f32.vlgmr.msra.gmra.mrb[6].mxu1 %vm991_vm2, %v1296_v5  ;;  %v1299_v12 = vld [vmem:[#allocation2 + $0x18] sm:$0xff] }
 0x3ed   : > { %2622 = vmatmul.mubr.msk.f32.vlgmr.msra.gmra.mrb[6].mxu0 %vm991_vm2, %v1298_v6  ;;  %2615 = vmatpush3.xpose.msk.msra.mxu1 %vm991_vm2, %v1301_v7 }
 0x3ee   : > { %2616 = vmatprep.mubr.msk.f32.mxu1 %vm3133_vm1, %v3131_v0  ;;  %2624 = vmatprep.subr.mxu1 %v3131_v0 }
 0x3ef   : > { %2631 = vmatprep.mubr.msk.f32.mxu0 %vm3133_vm1, %v3131_v0 }
 0x3f0   : > { %2617 = vmatmul.mubr.msk.f32.vlgmr.msra.gmra.mrb[8].mxu1 %vm991_vm2, %v1297_v9 }
 0x3f1   : > { %2625 = vmatpush3.xpose.msk.msra.mxu1 %vm991_vm2, %v1303_v11  ;;  %2626 = vmatprep.mubr.msk.f32.mxu1 %vm3133_vm1, %v3131_v0 }
 0x3f2   : > { %2634 = vmatprep.subr.mxu1 %v3131_v0 }
 0x3f4   : > { %2627 = vmatmul.mubr.msk.f32.vlgmr.msra.gmra.mrb[10].mxu1 %vm991_vm2, %v1299_v12 }
 0x3f5   : > { %2636 = vmatprep.mubr.msk.f32.mxu1 %vm3133_vm1, %v3131_v0 }
 0x4bf   : > { %v1380_v13 = vpop.f32.mrb[6].mxu1 }
 0x4c0   : > { %v1532_v14 = vpop.f32.mrb[6].mxu0  ;;  %v1612_v15 = vmul.f32 0.35355338, %v1380_v13  ;;  %v2613_v16 = vpop.f32.mrb[7].mxu1 }
 0x4c1   : > { %v2623_v17 = vpop.f32.mrb[7].mxu0  ;;  %v1614_v18 = vmul.f32 0.35355338, %v1532_v14 }
 0x4c2   : > { %v1616_v19 = vsel %vm991_vm2, %v1612_v15, -inf }
 0x4c3   : > { %1617 = vmax.xlane.f32.xlu0 %v1616_v19  ;;  %v1456_v21 = vpop.f32.mrb[8].mxu1  ;;  %v1622_v25 = vsel %vm991_vm2, %v1614_v18, -inf }
 0x4c4   : > { %v1613_v22 = vmul.f32 0.35355338, %v1456_v21  ;;  %v2618_v23 = vpop.f32.mrb[9].mxu1 }
 0x4c6   : > { %v1619_v24 = vsel %vm991_vm2, %v1613_v22, -inf }
 0x4c7   : > { %1620 = vmax.xlane.f32.xlu1 %v1619_v24  ;;  %v1608_v26 = vpop.f32.mrb[10].mxu1  ;;  %1623 = vmax.xlane.f32.xlu0 %v1622_v25 }
 0x4c8   : > { %v1615_v27 = vmul.f32 0.35355338, %v1608_v26  ;;  %v2628_v28 = vpop.f32.mrb[11].mxu1 }
 0x4ca   : > { %v1625_v29 = vsel %vm991_vm2, %v1615_v27, -inf }
 0x4cb   : > { %1626 = vmax.xlane.f32.xlu0 %v1625_v29 }
 0x4d8   : > { %1147 = vrot.lane.b32.xlu1 %v524_v32, %s3134_s13 }
 0x4dc   : > { %1153 = vrot.lane.b32.xlu1 %v524_v32, %s3135_s11  ;;  %s3695_s11 = scalar_lea.hbm %s3747_s7, %s2361_s14 }
 0x4e1   : > { %1150 = vrot.lane.b32.xlu0 %v524_v32, %s3136_s9  ;;  %s2199_s9 = scalar_lea.sflag [#allocation8], %s3404_s28 }
 0x550   : > { %v1618_v33 = vpop.xlane.xlu0 %1617 }
 0x551   : > { %v1628_v34 = vsub.f32 %v1612_v15, %v1618_v33 }
 0x553   : > { %v1632_v35 = vmul.f32 1.442695, %v1628_v34 }
 0x554   : > { %v1621_v36 = vpop.xlane.xlu1 %1620  ;;  %v1624_v37 = vpop.xlane.xlu0 %1623 }
 0x555   : > { %2888 = vpow2.f32 %v1632_v35  ;;  %v1629_v38 = vsub.f32 %v1613_v22, %v1621_v36  ;;  %v1630_v39 = vsub.f32 %v1614_v18, %v1624_v37 }
 0x557   : > { %v1634_v40 = vmul.f32 1.442695, %v1629_v38  ;;  %v1636_v8 = vmul.f32 1.442695, %v1630_v39 }
 0x558   : > { %v1148_v41 = vpop.permute.xlu1 %1147  ;;  %v1627_v10 = vpop.xlane.xlu0 %1626 }
 0x559   : > { %2890 = vpow2.f32 %v1634_v40  ;;  %v1631_v20 = vsub.f32 %v1615_v27, %v1627_v10 }
 0x55a   : > { %2892 = vpow2.f32 %v1636_v8 }
 0x55b   : > { %v1638_v42 = vmul.f32 1.442695, %v1631_v20 }
 0x55c   : > { %v1154_v43 = vpop.permute.xlu1 %1153  ;;  %v1151_v44 = vpop.permute.xlu0 %1150 }
 0x55d   : > { %2894 = vpow2.f32 %v1638_v42  ;;  %v1172_v46 = vcombine.low %v1148_v41, %v1154_v43  ;;  %v1173_v47 = vcombine.high %v1148_v41, %v1154_v43  ;;  %v1156_v48 = vcombine.low %v524_v32, %v1151_v44 }
 0x55e   : > { %v1157_v49 = vcombine.high %v524_v32, %v1151_v44 }
 0x55f   : > { %v3622_v50 = vpop.eup %2888  ;;  %v1180_v51 = vrot.slane %v1172_v46, %v3547_v45  ;;  %v1187_v53 = vrot.slane %v1173_v47, %v3547_v45  ;;  %v1164_v54 = vrot.slane %v1156_v48, %v3547_v45  ;;  %v2113_v46 = vld [vmem:[#allocation14] sm:$0xff]  ;;  %v2114_v47 = vld [vmem:[#allocation14 + $0x8] sm:$0xff] }
 0x560   : > { %v1171_v55 = vrot.slane %v1157_v49, %v3547_v45  ;;  %v1640_v56 = vsel %vm991_vm2, %v3622_v50, 0.0  ;;  %v2771_v48 = vpack.c.bf16 %v2114_v47, %v2113_v46 }
 0x561   : > { %v1188_v57 = vcombine.low %v1164_v54, %v1180_v51  ;;  %v1189_v58 = vcombine.high %v1164_v54, %v1180_v51  ;;  %1641 = vadd.xlane.f32.xlu1 %v1640_v56 }
 0x562   : > { %v1204_v59 = vcombine.low %v1171_v55, %v1187_v53  ;;  %v1205_v60 = vcombine.high %v1171_v55, %v1187_v53 }
 0x563   : > { %v2891_v61 = vpop.eup %2890  ;;  %v1196_v62 = vrot.slane %v1188_v57, %v3550_v52  ;;  %v1203_v63 = vrot.slane %v1189_v58, %v3550_v52 }
 0x564   : > { %v1212_v2 = vrot.slane %v1204_v59, %v3550_v52  ;;  %v1219_v3 = vrot.slane %v1205_v60, %v3550_v52  ;;  %v1643_v4 = vsel %vm991_vm2, %v2891_v61, 0.0  ;;  %v2893_v5 = vpop.eup %2892 }
 0x565   : > { %v1224_v6 = vcombine.low %v1196_v62, %v1203_v63  ;;  %v2342_v7 = vcombine.high %v1196_v62, %v1203_v63  ;;  %1644 = vadd.xlane.f32.xlu0 %v1643_v4  ;;  %v1646_v17 = vsel %vm991_vm2, %v2893_v5, 0.0 }
 0x566   : > { %v1240_v9 = vcombine.low %v1212_v2, %v1219_v3  ;;  %v2343_v11 = vcombine.high %v1212_v2, %v1219_v3 }
 0x567   : > { %v2895_v12 = vpop.eup %2894  ;;  %v1231_v13 = vrot.slane %v1224_v6, %v3547_v45  ;;  %v1239_v14 = vrot.slane %v2342_v7, %v3547_v45  ;;  %v2115_v6 = vld [vmem:[#allocation14 + $0x10] sm:$0xff]  ;;  %v2116_v7 = vld [vmem:[#allocation14 + $0x18] sm:$0xff] }
 0x568   : > { %v1247_v15 = vrot.slane %v1240_v9, %v3547_v45  ;;  %v1255_v16 = vrot.slane %v2343_v11, %v3547_v45  ;;  %v1649_v18 = vsel %vm991_vm2, %v2895_v12, 0.0 }
 0x569   : > { %v1256_v19 = vcombine.low %v1231_v13, %v1239_v14  ;;  %v1257_v21 = vcombine.high %v1231_v13, %v1239_v14  ;;  %1647 = vadd.xlane.f32.xlu0 %v1646_v17  ;;  %1650 = vadd.xlane.f32.xlu1 %v1649_v18  ;;  %v2774_v14 = vpack.c.bf16 %v2116_v7, %v2115_v6 }
 0x56a   : > { %v1272_v22 = vcombine.low %v1247_v15, %v1255_v16  ;;  %v1273_v23 = vcombine.high %v1247_v15, %v1255_v16 }
 0x56b   : > { %v1264_v24 = vrot.slane %v1256_v19, %v3550_v52  ;;  %v1271_v25 = vrot.slane %v1257_v21, %v3550_v52 }
 0x56c   : > { %v1280_v26 = vrot.slane %v1272_v22, %v3550_v52  ;;  %v1287_v27 = vrot.slane %v1273_v23, %v3550_v52 }
 0x56e   : > { %v1288_v28 = vcombine.low %v1264_v24, %v1280_v26  ;;  %v1289_v29 = vcombine.high %v1264_v24, %v1280_v26  ;;  %v1290_v30 = vcombine.low %v1271_v25, %v1287_v27  ;;  %v1291_v31 = vcombine.high %v1271_v25, %v1287_v27 }
 0x570   : > { %1292 = vst.msk [vmem:[#allocation4] sm:$0xff] %vm991_vm2, %v1288_v28  ;;  %1293 = vst.msk [vmem:[#allocation4 + $0x8] sm:$0xff] %vm991_vm2, %v1289_v29 }
 0x571   : > { %1294 = vst.msk [vmem:[#allocation4 + $0x10] sm:$0xff] %vm991_vm2, %v1290_v30  ;;  %1295 = vst.msk [vmem:[#allocation4 + $0x18] sm:$0xff] %vm991_vm2, %v1291_v31 }
 0x577   : > { %v1304_v32 = vld [vmem:[#allocation4] sm:$0xff]  ;;  %v1305_v33 = vld [vmem:[#allocation4 + $0x8] sm:$0xff] }
 0x578   : > { %2630 = vmatpush3.msra.mxu0 %v1304_v32  ;;  %2635 = vmatpush3.msra.mxu1 %v1305_v33  ;;  %v1306_v40 = vld [vmem:[#allocation4 + $0x10] sm:$0xff]  ;;  %v1307_v10 = vld [vmem:[#allocation4 + $0x18] sm:$0xff] }
 0x579   : > { %2639 = vmatprep.subr.mxu0 %v3131_v0  ;;  %2644 = vmatprep.subr.mxu1 %v3131_v0 }
 0x5ee   : > { %v1642_v34 = vpop.xlane.xlu1 %1641 }
 0x5ef   : > { %2896 = vrcp.f32 %v1642_v34 }
 0x5f2   : > { %v1645_v35 = vpop.xlane.xlu0 %1644 }
 0x5f3   : > { %2898 = vrcp.f32 %v1645_v35 }
 0x5f6   : > { %v1651_v36 = vpop.xlane.xlu1 %1650  ;;  %v1648_v37 = vpop.xlane.xlu0 %1647 }
 0x5f7   : > { %2900 = vrcp.f32 %v1651_v36 }
 0x5f8   : > { %2902 = vrcp.f32 %v1648_v37 }
 0x5f9   : > { %v2897_v38 = vpop.eup %2896 }
 0x5fa   : > { %v1656_v39 = vmul.f32 %v2897_v38, %v3622_v50 }
 0x5fc   : > { %2632 = vmatmul.mubr.msk.f32.vlgmr.msra.gmra.mrb[8].mxu0 %vm991_vm2, %v1656_v39 }
 0x5fd   : > { %v2899_v8 = vpop.eup %2898  ;;  %2640 = vmatpush3.msra.mxu0 %v1306_v40  ;;  %2641 = vmatprep.mubr.msk.f32.mxu0 %vm3133_vm1, %v3131_v0  ;;  %v2358_v40 = vld [vmem:[%s3746_s6] ss:$0 sm:$0xff] }
 0x5fe   : > { %v1657_v41 = vmul.f32 %v2899_v8, %v2891_v61  ;;  %2770 = vmatprep.subr.bf16.mxu0 %v3132_v1 }
 0x600   : > { %2637 = vmatmul.mubr.msk.f32.vlgmr.msra.gmra.mrb[12].mxu1 %vm991_vm2, %v1657_v41 }
 0x601   : > { %v2901_v20 = vpop.eup %2900  ;;  %2645 = vmatpush3.msra.mxu1 %v1307_v10  ;;  %2646 = vmatprep.mubr.msk.f32.mxu1 %vm3133_vm1, %v3131_v0 }
 0x602   : > { %v2903_v42 = vpop.eup %2902  ;;  %v1659_v43 = vmul.f32 %v2901_v20, %v2895_v12 }
 0x603   : > { %v1658_v44 = vmul.f32 %v2903_v42, %v2893_v5 }
 0x604   : > { %2647 = vmatmul.mubr.msk.f32.vlgmr.msra.gmra.mrb[14].mxu1 %vm991_vm2, %v1659_v43 }
 0x605   : > { %2642 = vmatmul.mubr.msk.f32.vlgmr.msra.gmra.mrb[10].mxu0 %vm991_vm2, %v1658_v44 }
 0x606   : > { %2657 = vmatprep.mubr.msk.f32.mxu0 %vm3133_vm1, %v3131_v0  ;;  %2772 = vmatpush3.bf16.msra.mxu0 %v2771_v48 }
 0x607   : > { %2773 = vmatprep.subr.bf16.mxu0 %v3132_v1 }
 0x60a   : > { %2775 = vmatpush3.bf16.msra.mxu0 %v2774_v14 }
 0x6cf   : > { %v1729_v49 = vpop.f32.mrb[8].mxu0 }
 0x6d0   : > { %1952 = vst.msk [vmem:[#allocation5] sm:$0xff] %vm991_vm2, %v1729_v49  ;;  %v2633_v50 = vpop.f32.mrb[9].mxu0 }
 0x6d3   : > { %v1802_v51 = vpop.f32.mrb[12].mxu1 }
 0x6d4   : > { %1953 = vst.msk [vmem:[#allocation5 + $0x8] sm:$0xff] %vm991_vm2, %v1802_v51  ;;  %v2638_v53 = vpop.f32.mrb[13].mxu1 }
 0x6d7   : > { %v1948_v54 = vpop.f32.mrb[14].mxu1 }
 0x6d8   : > { %v1875_v55 = vpop.f32.mrb[10].mxu0  ;;  %1955 = vst.msk [vmem:[#allocation5 + $0x18] sm:$0xff] %vm991_vm2, %v1948_v54  ;;  %v2648_v56 = vpop.f32.mrb[15].mxu1 }
 0x6d9   : > { %1954 = vst.msk [vmem:[#allocation5 + $0x10] sm:$0xff] %vm991_vm2, %v1875_v55  ;;  %v2643_v0 = vpop.f32.mrb[11].mxu0 }
 0x6df   : > { %v2881_v57 = vld [vmem:[#allocation5 + $0x8] ss:$16 sps:$4 sm:$0xff]   ;;  %v2883_v58 = vld [vmem:[#allocation5 + $0xc] ss:$16 sps:$4 sm:$0xff]  }
 0x6e0   : > { %v2878_v59 = vld [vmem:[#allocation5] ss:$16 sps:$4 sm:$0xff]   ;;  %v2880_v1 = vld [vmem:[#allocation5 + $0x4] ss:$16 sps:$4 sm:$0xff]   ;;  %v1984_v60 = vrot.slane %v2881_v57, %v3547_v45  ;;  %v1991_v61 = vrot.slane %v2883_v58, %v3547_v45 }
 0x6e1   : > { %v1968_v62 = vrot.slane %v2878_v59, %v3547_v45  ;;  %v1975_v63 = vrot.slane %v2880_v1, %v3547_v45 }
 0x6e3   : > { %v1992_v2 = vcombine.low %v1968_v62, %v1984_v60  ;;  %v1993_v3 = vcombine.high %v1968_v62, %v1984_v60  ;;  %v2008_v4 = vcombine.low %v1975_v63, %v1991_v61  ;;  %v2009_v5 = vcombine.high %v1975_v63, %v1991_v61 }
 0x6e5   : > { %v2000_v9 = vrot.slane %v1992_v2, %v3550_v52  ;;  %v2007_v11 = vrot.slane %v1993_v3, %v3550_v52  ;;  %v2016_v12 = vrot.slane %v2008_v4, %v3550_v52  ;;  %v2023_v13 = vrot.slane %v2009_v5, %v3550_v52 }
 0x6e7   : > { %v2028_v15 = vcombine.low %v2000_v9, %v2007_v11  ;;  %v2356_v16 = vcombine.high %v2000_v9, %v2007_v11  ;;  %v2044_v17 = vcombine.low %v2016_v12, %v2023_v13  ;;  %v2357_v18 = vcombine.high %v2016_v12, %v2023_v13 }
 0x6e9   : > { %v2035_v19 = vrot.slane %v2028_v15, %v3547_v45  ;;  %v2043_v21 = vrot.slane %v2356_v16, %v3547_v45  ;;  %v2051_v22 = vrot.slane %v2044_v17, %v3547_v45  ;;  %v2059_v23 = vrot.slane %v2357_v18, %v3547_v45 }
 0x6eb   : > { %v2061_v24 = vcombine.high %v2035_v19, %v2043_v21  ;;  %v2077_v25 = vcombine.high %v2051_v22, %v2059_v23  ;;  %v2060_v26 = vcombine.low %v2035_v19, %v2043_v21  ;;  %v2076_v27 = vcombine.low %v2051_v22, %v2059_v23 }
 0x6ed   : > { %v2075_v28 = vrot.slane %v2061_v24, %v3550_v52  ;;  %v2091_v29 = vrot.slane %v2077_v25, %v3550_v52  ;;  %v2068_v30 = vrot.slane %v2060_v26, %v3550_v52  ;;  %v2084_v31 = vrot.slane %v2076_v27, %v3550_v52 }
 0x6ef   : > { %v2094_v32 = vcombine.low %v2075_v28, %v2091_v29  ;;  %v2093_v33 = vcombine.high %v2068_v30, %v2084_v31  ;;  %v2092_v34 = vcombine.low %v2068_v30, %v2084_v31  ;;  %v2095_v45 = vcombine.high %v2075_v28, %v2091_v29 }
 0x6f1   : > { %2101 = vrot.lane.b32.xlu1 %v2094_v32, %s3139_s29  ;;  %2097 = vrot.lane.b32.xlu0 %v2093_v33, %s3140_s23  ;;  %s3050_s29 = sshll.u32 %s3142_s18, 4  ;;  %s3051_s29 = int_to_ptr.vmem [resolvable:$false] %s3050_s29 }
 0x6f2   : > { %s3052_s23 = scalar_lea.vmem %s3051_s29, 256  ;;  %p3053_p10 = scmp.lt.s32.totalorder %s3697_s8, %s3051_s29 }
 0x6f3   : > { %p3054_p1 = scmp.lt.s32.totalorder %s3052_s23, %s3046_s30 }
 0x6f5   : > { %2105 = vrot.lane.b32.xlu1 %v2095_v45, %s3141_s21  ;;  %p3055_p11 = por %p3054_p1, %p3053_p10 }
 0x6f7   : > { %p3056_p12 = pnand %p3055_p11, %p3049_p5 }
 0x763   : > { %v2102_v35 = vpop.permute.xlu1 %2101  ;;  %v2098_v36 = vpop.permute.xlu0 %2097 }
 0x764   : > { %v2108_v37 = vsel %vm991_vm2, %v2092_v34, %v2098_v36 }
 0x765   : > { %v2110_v38 = vsel %vm2109_vm3, %v2108_v37, %v2102_v35 }
 0x767   : > { %v2106_v52 = vpop.permute.xlu1 %2105 }
 0x768   : > { %v2112_v39 = vsel %vm2111_vm4, %v2110_v38, %v2106_v52 }
 0x769   : > { %2658 = vmatmul.mubr.msk.f32.vlgmr.msra.gmra.mrb[12].mxu0 %vm382_vm0, %v2112_v39 }
 0x83c   : > { %v2193_v8 = vpop.f32.mrb[12].mxu0 }
 0x83d   : > { %v2194_v41 = vadd.f32 %v2358_v40, %v2193_v8  ;;  %v2659_v10 = vpop.f32.mrb[13].mxu0 }
 0x83f   : > { %2197 = vst.msk [vmem:[%s351_s20] sm:$0xff] %vm382_vm0, %v2194_v41 }
 0x840   : > { %3059 = shalt.err (!%p3056_p12)
}
 0x841   : > { %s3060_s28 = scalar_lea.hbm %s3695_s11, 128  ;;  %s3064_s17 = scalar_lea.hbm %s3747_s7, 256 }
 0x842   : > { %p3061_p13 = scmp.ne.s32.totalorder %s3695_s11, %s3060_s28  ;;  %p3065_p9 = scmp.lt.u32.totalorder %s3695_s11, %s3747_s7 }
 0x843   : > { %p3066_p4 = scmp.lt.u32.totalorder %s3064_s17, %s3060_s28  ;;  %p3068_p6 = scmp.lt.u32.totalorder %s3060_s28, %s3695_s11 }
 0x844   : > { %p3062_p3 = pnand %p3061_p13, %p3765_p0 }
 0x845   : > { %p3067_p8 = por %p3066_p4, %p3065_p9 }
 0x846   : > { %p3063_p7 = pneg %p3062_p3 }
 0x847   : > { %p3069_p2 = por %p3068_p6, %p3067_p8 }
 0x849   : > { %p3070_p5 = pnand %p3069_p2, %p3063_p7 }
 0x84b   : > { %3073 = shalt.err (!%p3070_p5)
}
 0x84c   : > { %2794 = dma.vmem_to_hbm [thread:$0]  (%p3765_p0), %s3697_s8, 128, %s3695_s11, %s2199_s9  }
 0x84d PF: > { %s2224_s22 = sand.u32 1, %s3108_s24   ;;  %p3766_p10 = scmp.ne.s32.totalorder %s3758_s15, 0 }
 0x84e   : > { %p3767_p1 = scmp.ge.s32.totalorder %s3120_s27, 2  ;;  %s2225_s13 = scalar_lea.sflag [#allocation8], %s2224_s22 }
 0x850   : > { %p2814_p11 = pnand %p3767_p1, %p3766_p10 }
 0x852   : > { %3103 = dma.done.wait (!%p2814_p11), %s2225_s13, 128  }
 0x853   : > { %3105 = vsyncadd (!%p2814_p11), %s2225_s13, 4294967168  ;;  %p22_p12 = scmp.ge.s32.totalorder %s3328_s19, 4   ;;  %s3768_s24 = smov %s3112_s25 }
 0x854   : > { %s3769_s25 = smov %s3116_s26  ;;  %s3770_s26 = smov %s3339_s12 }
 0x855   : > { %s3771_s27 = smov %s3328_s19  ;;  %24 = sbr.rel (!%p22_p12) target bundleno = 7 (0x7), region = 109 }
 0x85c   :  { %2230 = vsyncpa [#allocation7], 1 }
 0x85d   :  { %2232 = vsyncpa [#allocation7 + $0x1], 1 }
 0x85e   :  { %2233 = vsyncpa [#allocation10], 1 }
 0x85f   :  { %2234 = vsyncpa [#allocation13], 1 }
 0x860   :  { %2235 = vsyncpa [#allocation8], 1 }
 0x861   :  { %2237 = vsyncpa [#allocation8 + $0x1], 1 }

// kernel: tpu_custom_call.1
= control target key start
LH: loop header
LB: loop body
LE: loop exit
PB: predicated region body
PF: predicated region fallthrough
CT: control target
= control target key end

     0   :  { %12 = vsyncpa [#allocation7], 0  ;;  %s3740_s0 = inlined_call_operand.hbm [shape: f32[2,8,32], index: 0, kind: input, shape index: {}]   ;;  %s3741_s1 = inlined_call_operand.hbm [shape: f32[32,288], index: 1, kind: input, shape index: {}]   ;;  %s3742_s2 = inlined_call_operand.vmem [shape: f32[1,288], index: 2, kind: input, shape index: {}]   ;;  %s3743_s3 = inlined_call_operand.hbm [shape: f32[128,128], index: 3, kind: input, shape index: {}]   ;;  %s3744_s4 = inlined_call_operand.hbm [shape: f32[128,128], index: 4, kind: input, shape index: {}]   ;;  %s3745_s5 = inlined_call_operand.hbm [shape: f32[32,32], index: 5, kind: input, shape index: {}]   ;;  %s3746_s6 = inlined_call_operand.vmem [shape: f32[1,32], index: 6, kind: input, shape index: {}]   ;;  %s3747_s7 = inlined_call_operand.hbm [shape: f32[2,8,32], index: 7, kind: output, shape index: {}]  }
   0x1   :  { %14 = vsyncpa [#allocation7 + $0x1], 0 }
   0x2   :  { %15 = vsyncpa [#allocation10], 0 }
   0x3   :  { %16 = vsyncpa [#allocation13], 0 }
   0x4   :  { %17 = vsyncpa [#allocation8], 0 }
   0x5   :  { %19 = vsyncpa [#allocation8 + $0x1], 0  ;;  %s3183_s24 = smov 0   ;;  %s3185_s25 = smov 0  }
   0x6   :  { %s3187_s26 = smov 0   ;;  %s3189_s27 = smov 0  }
   0x7 LB: > { %s3122_s28 = smov [#allocation9]   ;;  %s3204_s30 = sadd.s32 4294967295, %s3120_s27   ;;  %s3120_s27 = sphi %s3189_s27, %s3771_s27   ;;  %s3116_s26 = sphi %s3187_s26, %s3770_s26   ;;  %s3112_s25 = sphi %s3185_s25, %s3769_s25   ;;  %s3108_s24 = sphi %s3183_s24, %s3768_s24  }
   0x8   : > { %s220_s29 = sshll.u32 %s3122_s28, 4  ;;  %p2321_p0 = scmp.ge.s32.totalorder %s3120_s27, 1  ;;  %s3209_s29 = int_to_ptr.vmem [resolvable:$true] %s220_s29 }
   0x9   : > { %p3748_p1 = scmp.eq.s32.totalorder %s3204_s30, 0  ;;  %p208_p2 = scmp.lt.s32.totalorder %s3120_s27, 3 }
   0xa   : > { %s3123_s10 = smov [#allocation12]   ;;  %s3124_s12 = smov [#allocation11]  }
   0xb   : > { %p3211_p3 = pnand %p2321_p0, %p208_p2  ;;  %s249_s11 = sshll.u32 %s3123_s10, 4  ;;  %s3224_s11 = int_to_ptr.vmem [resolvable:$true] %s249_s11 }
   0xc   : > { %s3226_s13 = sshll.u32 %s3124_s12, 4  ;;  %s2904_s16 = scalar_lea.hbm %s3741_s1, 1536  ;;  %s237_s13 = int_to_ptr.vmem [resolvable:$true] %s3226_s13 }
   0xd   : > { %s3751_s8 = scalar_select %p3211_p3, 1, 0 }
   0xe   : > { %p2796_p5 = pneg %p3211_p3  ;;  %p2905_p7 = scmp.ne.s32.totalorder %s3741_s1, %s2904_s16 }
   0xf   : > { %p2911_p11 = scmp.lt.u32.totalorder %s2904_s16, %s3741_s1 }
  0x10   : > { %p3220_p6 = pnand %p2796_p5, %p3748_p1 }
  0x12   : > { %p3236_p8 = pneg %p3220_p6 }
  0x14   : > { %p2907_p9 = pnand %p3236_p8, %p2905_p7 }
  0x16   : > { %p2908_p10 = pneg %p2907_p9 }
  0x18   : > { %p2913_p12 = pnand %p2911_p11, %p2908_p10 }
  0x1a   : > { %2916 = shalt.err (!%p2913_p12)
}
  0x1b   : > { %s2917_s22 = scalar_lea.vmem %s3209_s29, 1536  ;;  %p2925_p5 = scmp.lt.s32.totalorder %s3209_s29, %s3209_s29 }
  0x1c   : > { %p2918_p13 = scmp.ne.s32.totalorder %s3209_s29, %s2917_s22  ;;  %p2926_p4 = scmp.lt.s32.totalorder %s2917_s22, %s2917_s22 }
  0x1e   : > { %p2920_p0 = pnand %p2918_p13, %p3236_p8  ;;  %p2927_p7 = por %p2926_p4, %p2925_p5 }
  0x20   : > { %p2921_p2 = pneg %p2920_p0 }
  0x22   : > { %p2928_p9 = pnand %p2927_p7, %p2921_p2 }
  0x24   : > { %2931 = shalt.err (!%p2928_p9)
}
  0x25   : > { %s3125_s23 = smov 384   ;;  %s3126_s28 = smov 24  }
  0x26   : > { %2799 = dma.hbm_to_vmem [thread:$0]  (!%p3220_p6), %s3741_s1, 1536, %s3209_s29, [#allocation10], %s3125_s23, %s3125_s23, %s3126_s28  }
  0x27   : > { %s2932_s16 = scalar_lea.hbm %s3744_s4, 2048 }
  0x28   : > { %p2933_p4 = scmp.ne.s32.totalorder %s3744_s4, %s2932_s16  ;;  %p2939_p12 = scmp.lt.u32.totalorder %s2932_s16, %s3744_s4 }
  0x2a   : > { %p2935_p10 = pnand %p2933_p4, %p3236_p8 }
  0x2c   : > { %p2936_p11 = pneg %p2935_p10 }
  0x2e   : > { %p2941_p13 = pnand %p2939_p12, %p2936_p11 }
  0x30   : > { %2944 = shalt.err (!%p2941_p13)
}
  0x31   : > { %s2945_s29 = scalar_lea.vmem %s3224_s11, 2048  ;;  %p2953_p7 = scmp.lt.s32.totalorder %s3224_s11, %s3224_s11 }
  0x32   : > { %p2946_p0 = scmp.ne.s32.totalorder %s3224_s11, %s2945_s29  ;;  %p2954_p9 = scmp.lt.s32.totalorder %s2945_s29, %s2945_s29 }
  0x34   : > { %p2948_p2 = pnand %p2946_p0, %p3236_p8  ;;  %p2955_p4 = por %p2954_p9, %p2953_p7 }
  0x36   : > { %p2949_p5 = pneg %p2948_p2 }
  0x38   : > { %p2956_p10 = pnand %p2955_p4, %p2949_p5 }
  0x3a   : > { %2959 = shalt.err (!%p2956_p10)
}
  0x3b   : > { %s3127_s22 = smov 128   ;;  %s3128_s23 = smov 8  }
  0x3c   : > { %2805 = dma.hbm_to_vmem [thread:$0]  (!%p3220_p6), %s3744_s4, 2048, %s3224_s11, [#allocation13], %s3127_s22, %s3127_s22, %s3128_s23  }
  0x3d   : > { %s2960_s15 = scalar_lea.hbm %s3743_s3, 2048 }
  0x3e   : > { %p2961_p11 = scmp.ne.s32.totalorder %s3743_s3, %s2960_s15  ;;  %p2967_p0 = scmp.lt.u32.totalorder %s2960_s15, %s3743_s3 }
  0x40   : > { %p2963_p12 = pnand %p2961_p11, %p3236_p8 }
  0x42   : > { %p2964_p13 = pneg %p2963_p12 }
  0x44   : > { %p2969_p2 = pnand %p2967_p0, %p2964_p13 }
  0x46   : > { %2972 = shalt.err (!%p2969_p2)
}
  0x47   : > { %s2973_s21 = scalar_lea.vmem %s237_s13, 2048  ;;  %p2981_p4 = scmp.lt.s32.totalorder %s237_s13, %s237_s13 }
  0x48   : > { %p2974_p5 = scmp.ne.s32.totalorder %s237_s13, %s2973_s21  ;;  %p2982_p10 = scmp.lt.s32.totalorder %s2973_s21, %s2973_s21 }
  0x4a   : > { %p2976_p7 = pnand %p2974_p5, %p3236_p8  ;;  %p2983_p1 = por %p2982_p10, %p2981_p4 }
  0x4c   : > { %p2977_p9 = pneg %p2976_p7 }
  0x4e   : > { %p2984_p3 = pnand %p2983_p1, %p2977_p9 }
  0x50   : > { %2987 = shalt.err (!%p2984_p3)
}
  0x51   : > { %2802 = dma.hbm_to_vmem [thread:$0]  (!%p3220_p6), %s3743_s3, 2048, %s237_s13, [#allocation10], %s3127_s22, %s3127_s22, %s3128_s23  }
  0x52   : > { %s3129_s28 = smov [#allocation14]   ;;  %s2988_s15 = scalar_lea.hbm %s3745_s5, 512 }
  0x53   : > { %s262_s10 = sshll.u32 %s3129_s28, 4  ;;  %p2989_p1 = scmp.ne.s32.totalorder %s3745_s5, %s2988_s15  ;;  %s263_s10 = int_to_ptr.vmem [resolvable:$true] %s262_s10 }
  0x54   : > { %p2995_p12 = scmp.lt.u32.totalorder %s2988_s15, %s3745_s5 }
  0x55   : > { %p2991_p3 = pnand %p2989_p1, %p3236_p8 }
  0x57   : > { %p2992_p11 = pneg %p2991_p3 }
  0x59   : > { %p2997_p13 = pnand %p2995_p12, %p2992_p11 }
  0x5b   : > { %3000 = shalt.err (!%p2997_p13)
}
  0x5c   : > { %s3001_s13 = scalar_lea.vmem %s263_s10, 512  ;;  %p3009_p7 = scmp.lt.s32.totalorder %s263_s10, %s263_s10 }
  0x5d   : > { %p3002_p0 = scmp.ne.s32.totalorder %s263_s10, %s3001_s13  ;;  %p3010_p9 = scmp.lt.s32.totalorder %s3001_s13, %s3001_s13 }
  0x5f   : > { %p3004_p2 = pnand %p3002_p0, %p3236_p8  ;;  %p3011_p4 = por %p3010_p9, %p3009_p7 }
  0x61   : > { %p3005_p5 = pneg %p3004_p2 }
  0x63   : > { %p3012_p10 = pnand %p3011_p4, %p3005_p5 }
  0x65   : > { %3015 = shalt.err (!%p3012_p10)
}
  0x66   : > { %2808 = dma.hbm_to_vmem [thread:$0]  (!%p3220_p6), %s3745_s5, 512, %s263_s10, [#allocation13], %s3127_s22, %s3127_s22, %s3128_s23  }
  0x67   : > { %s2320_s9 = sadd.s32 4294967294, %s3120_s27   ;;  %s3328_s19 = sadd.s32 1, %s3120_s27  }
  0x68   : > { %s29_s29 = ssub.s32 %s3120_s27, %s3328_s19  ;;  %s32_s28 = sadd.s32 1, %s3116_s26 }
  0x69   : > { %p30_p8 = scmp.eq.s32.totalorder %s29_s29, 0  ;;  %p39_p1 = scmp.ne.s32.totalorder %s3116_s26, %s3112_s25 }
  0x6a   : > { %p40_p3 = scmp.eq.s32.totalorder %s3120_s27, 0  ;;  %p45_p11 = scmp.ne.s32.totalorder %s3112_s25, %s3108_s24 }
  0x6b   : > { %s3339_s12 = scalar_select %p30_p8, %s3116_s26, %s32_s28  }
  0x6c   : > { %p3341_p12 = por %p40_p3, %p39_p1  ;;  %p3755_p13 = scmp.eq.s32.totalorder %s3204_s30, 0 }
  0x6d   : > { %p195_p0 = scmp.eq.s32.totalorder %s3204_s30, 1  ;;  %p201_p2 = scmp.eq.s32.totalorder %s2320_s9, 1 }
  0x6e   : > { %p3347_p6 = por %p3755_p13, %p45_p11  ;;  %p2821_p5 = scmp.lt.s32.totalorder %s3120_s27, 2 }
  0x6f   : > { %s279_s23 = sand.u32 1, %s3116_s26   ;;  %p3354_p7 = por %p195_p0, %p39_p1 }
  0x70   : > { %p3358_p9 = por %p201_p2, %p45_p11  ;;  %s2327_s16 = sshll.u32 %s279_s23, 3 }
  0x71   : > { %s3757_s10 = scalar_select %p3354_p7, 1, 0 }
  0x72   : > { %s3758_s15 = scalar_select %p3358_p9, 1, 0 }
  0x73   : > { %s2328_s17 = sshll.u32 %s3120_s27, 7  ;;  %s283_s21 = scalar_lea.vmem [#allocation6], %s2327_s16 }
  0x74   : > { %s3366_s13 = scalar_lea.hbm %s3740_s0, %s2328_s17  ;;  %s290_s11 = sshll.u32 %s283_s21, 4  ;;  %s3368_s11 = int_to_ptr.vmem [resolvable:$true] %s290_s11 }
  0x75   : > { %p3372_p4 = pnand %p2821_p5, %p3341_p12  ;;  %s280_s29 = scalar_lea.sflag [#allocation7], %s279_s23 }
  0x76   : > { %s3016_s28 = scalar_lea.hbm %s3366_s13, 128  ;;  %s3021_s18 = scalar_lea.hbm %s3740_s0, 256 }
  0x77   : > { %p3017_p10 = scmp.ne.s32.totalorder %s3366_s13, %s3016_s28  ;;  %p3018_p8 = pneg %p3372_p4 }
  0x78   : > { %p3022_p11 = scmp.lt.u32.totalorder %s3366_s13, %s3740_s0  ;;  %p3023_p12 = scmp.lt.u32.totalorder %s3021_s18, %s3016_s28 }
  0x79   : > { %p3019_p1 = pnand %p3018_p8, %p3017_p10  ;;  %p3025_p0 = scmp.lt.u32.totalorder %s3016_s28, %s3366_s13 }
  0x7a   : > { %p3024_p13 = por %p3023_p12, %p3022_p11 }
  0x7b   : > { %p3020_p3 = pneg %p3019_p1 }
  0x7c   : > { %p3026_p2 = por %p3025_p0, %p3024_p13 }
  0x7e   : > { %p3027_p5 = pnand %p3026_p2, %p3020_p3 }
  0x80   : > { %3030 = shalt.err (!%p3027_p5)
}
  0x81   : > { %s3031_s23 = scalar_lea.vmem %s3368_s11, 128  ;;  %s3130_s21 = smov [#allocation6]  }
  0x82   : > { %p3032_p10 = scmp.ne.s32.totalorder %s3368_s11, %s3031_s23  ;;  %s3036_s16 = sshll.u32 %s3130_s21, 4  ;;  %s3037_s16 = int_to_ptr.vmem [resolvable:$false] %s3036_s16 }
  0x83   : > { %s3038_s17 = scalar_lea.vmem %s3037_s16, 256  ;;  %p3039_p7 = scmp.lt.s32.totalorder %s3368_s11, %s3037_s16 }
  0x84   : > { %p3034_p1 = pnand %p3032_p10, %p3018_p8  ;;  %p3040_p11 = scmp.lt.s32.totalorder %s3038_s17, %s3031_s23 }
  0x86   : > { %p3035_p9 = pneg %p3034_p1  ;;  %p3041_p12 = por %p3040_p11, %p3039_p7 }
  0x88   : > { %p3042_p13 = pnand %p3041_p12, %p3035_p9 }
  0x8a   : > { %3045 = shalt.err (!%p3042_p13)
}
  0x8b   : > { %2812 = dma.hbm_to_vmem [thread:$0]  (!%p3372_p4), %s3366_s13, 128, %s3368_s11, %s280_s29  }
  0x8c   : > { %p3760_p3 = scmp.ne.s32.totalorder %s3751_s8, 0 }
  0x8d   : > { %s3404_s28 = sand.u32 (!%p3760_p3), 1, %s3112_s25  }
  0x8e   : > { %299 = sbr.rel (%p3760_p3) target bundleno = 2125 (0x84d), region = 48  ;;  %s2330_s18 = sshll.u32 (!%p3760_p3), %s3404_s28, 3 }
  0x8f   : > { %s302_s14 = scalar_lea.sflag (!%p3760_p3), [#allocation7], %s3404_s28  ;;  %s305_s20 = scalar_lea.vmem (!%p3760_p3), [#allocation6], %s2330_s18 }
  0x95   : > { %3091 = dma.done.wait (%p3347_p6), %s302_s14, 128  }
  0x96   : > { %3093 = vsyncadd (%p3347_p6), %s302_s14, 4294967168  ;;  %p3761_p7 = scmp.eq.s32.totalorder %s3204_s30, 0 }
  0x98   : > { %3095 = dma.done.wait (%p3761_p7), [#allocation10], 3584   ;;  %p3762_p9 = pmov %p3761_p7 }
  0x99   : > { %p3763_p4 = pmov %p3761_p7 }
  0x9a   : > { %3097 = vsyncadd (%p3762_p9), [#allocation10], 4294963712 }
  0x9b   : > { %3099 = dma.done.wait (%p3763_p4), [#allocation13], 2560   ;;  %p3764_p8 = pmov %p3763_p4 }
  0x9c   : > { %v3131_v0 = vmov 0.0   ;;  %v3132_v1 = vmov 0.0|0.0   ;;  %v354_v2 = vld [vmem:[#allocation9 + $0x8] sm:$0xff]  ;;  %v357_v3 = vld [vmem:[#allocation9 + $0x20] sm:$0xff]  ;;  %v356_v6 = vld [vmem:[#allocation9 + $0x18] sm:$0xff]  ;;  %vm382_vm0 = vcmask 261120  }
  0x9d   : > { %3101 = vsyncadd (%p3764_p8), [#allocation13], 4294964736  ;;  %450 = vmatprep.mubr.f32.mxu0 %v3131_v0  ;;  %2668 = vmatprep.subr.bf16.mxu1 %v3132_v1  ;;  %v353_v4 = vld [vmem:[#allocation9] sm:$0xff]  ;;  %v2660_v5 = vpack.c.bf16 %v357_v3, %v354_v2  ;;  %v360_v7 = vld [vmem:[#allocation9 + $0x38] sm:$0xff]  ;;  %vm3133_vm1 = vmmov 0   ;;  %s3134_s13 = smov 120  }
  0x9e   : > { %v363_v8 = vld [vmem:[#allocation9 + $0x50] sm:$0xff]  ;;  %v2662_v9 = vpack.c.bf16 %v356_v6, %v353_v4  ;;  %v362_v12 = vld [vmem:[#allocation9 + $0x48] sm:$0xff]  ;;  %v528_v14 = vld [vmem:[#allocation11] sm:$0xff]  ;;  %2466 = vmatprep.mubr.msk.f32.mxu1 %vm3133_vm1, %v3131_v0  ;;  %s3135_s11 = smov 104   ;;  %s3136_s9 = smov 112   ;;  %vm991_vm2 = vcmask 64512  }
  0x9f   : > { %v2664_v10 = vpack.c.bf16 %v363_v8, %v360_v7  ;;  %v359_v11 = vld [vmem:[#allocation9 + $0x30] sm:$0xff]  ;;  %2661 = vmatprep.subr.bf16.mxu0 %v2660_v5  ;;  %v529_v15 = vld [vmem:[#allocation11 + $0x8] sm:$0xff]  ;;  %v531_v19 = vld [vmem:[#allocation11 + $0x18] sm:$0xff]  ;;  %v367_v7 = vlaneseq  ;;  %s3139_s29 = smov 16   ;;  %s3140_s23 = smov 8   ;;  %vm2109_vm3 = vcmask 130048  }
  0xa0   : > { %2663 = vmatpush1.bf16.msra.mxu0 %v2662_v9  ;;  %v2666_v13 = vpack.c.bf16 %v362_v12, %v359_v11  ;;  %v352_v16 = vld [vmem:[%s305_s20] sm:$0xff]  ;;  %v3424_v17 = vpack.c.bf16 %v529_v15, %v528_v14  ;;  %v532_v21 = vld [vmem:[#allocation11 + $0x20] sm:$0xff]  ;;  %v533_v22 = vld [vmem:[#allocation11 + $0x28] sm:$0xff]  ;;  %s3141_s21 = smov 24   ;;  %vm2111_vm4 = vcmask 195584   ;;  %s2361_s14 = sshll.u32 %s3204_s30, 7 }
  0xa1   : > { %2665 = vmatprep.subr.bf16.mxu0 %v2664_v10  ;;  %v530_v18 = vld [vmem:[#allocation11 + $0x10] sm:$0xff]  ;;  %v3433_v23 = vpack.c.bf16 %v533_v22, %v532_v21  ;;  %v535_v25 = vld [vmem:[#allocation11 + $0x38] sm:$0xff]  ;;  %v536_v27 = vld [vmem:[#allocation11 + $0x40] sm:$0xff]  ;;  %v3490_v8 = vshrl.u32 %v367_v7, 7  ;;  %s351_s20 = scalar_lea.vmem [#allocation15], %s2330_s18  ;;  %p3765_p0 = scmp.ne.s32.totalorder %s3757_s10, 0 }
  0xa2   : > { %v3429_v20 = vpack.c.bf16 %v531_v19, %v530_v18  ;;  %v534_v24 = vld [vmem:[#allocation11 + $0x30] sm:$0xff]  ;;  %v537_v28 = vld [vmem:[#allocation11 + $0x48] sm:$0xff]  ;;  %v539_v31 = vld [vmem:[#allocation11 + $0x58] sm:$0xff]  ;;  %s2212_s8 = sshll.u32 %s351_s20, 4  ;;  %s3142_s18 = smov [#allocation15]   ;;  %s3697_s8 = int_to_ptr.vmem [resolvable:$true] %s2212_s8 }
  0xa3   : > { %v3437_v26 = vpack.c.bf16 %v535_v25, %v534_v24  ;;  %v3441_v29 = vpack.c.bf16 %v537_v28, %v536_v27  ;;  %v538_v30 = vld [vmem:[#allocation11 + $0x50] sm:$0xff]  ;;  %v540_v33 = vld [vmem:[#allocation11 + $0x60] sm:$0xff]  ;;  %v541_v34 = vld [vmem:[#allocation11 + $0x68] sm:$0xff]  ;;  %v369_v9 = vsub.s32 0, %v3490_v8  ;;  %s3046_s30 = scalar_lea.vmem %s3697_s8, 128 }
  0xa4   : > { %2667 = vmatpush1.bf16.msra.mxu0 %v2666_v13  ;;  %v3445_v32 = vpack.c.bf16 %v539_v31, %v538_v30  ;;  %v3449_v35 = vpack.c.bf16 %v541_v34, %v540_v33  ;;  %v542_v36 = vld [vmem:[#allocation11 + $0x70] sm:$0xff]  ;;  %v543_v37 = vld [vmem:[#allocation11 + $0x78] sm:$0xff]  ;;  %v358_v40 = vld [vmem:[#allocation9 + $0x28] sm:$0xff]  ;;  %p3047_p6 = scmp.ne.s32.totalorder %s3697_s8, %s3046_s30 }
  0xa5   : > { %2674 = vmatprep.subr.bf16.mxu0 %v3132_v1  ;;  %v3454_v38 = vpack.c.bf16 %v543_v37, %v542_v36  ;;  %v355_v39 = vld [vmem:[#allocation9 + $0x10] sm:$0xff]  ;;  %v361_v41 = vld [vmem:[#allocation9 + $0x40] sm:$0xff]  ;;  %v364_v43 = vld [vmem:[#allocation9 + $0x58] sm:$0xff]  ;;  %v3137_v36 = vmov 1983009808  }
  0xa6   : > { %v2669_v42 = vpack.c.bf16 %v358_v40, %v355_v39  ;;  %v2672_v44 = vpack.c.bf16 %v364_v43, %v361_v41  ;;  %v614_v45 = vld [vmem:[#allocation12] sm:$0xff]  ;;  %v615_v46 = vld [vmem:[#allocation12 + $0x8] sm:$0xff]  ;;  %v616_v48 = vld [vmem:[#allocation12 + $0x10] sm:$0xff]  ;;  %v858_v37 = vunpack.c.l.s4 %v3137_v36  ;;  %v3138_v39 = vmov 1934713408   ;;  %p3048_p2 = pnand %p3047_p6, %p3765_p0 }
  0xa7   : > { %2336 = vmatmul.mubr.msk.f32.vlgmr.msra.gmra.mrb[0].mxu0 %vm382_vm0, %v352_v16  ;;  %v3463_v47 = vpack.c.bf16 %v615_v46, %v614_v45  ;;  %v617_v49 = vld [vmem:[#allocation12 + $0x18] sm:$0xff]  ;;  %v618_v51 = vld [vmem:[#allocation12 + $0x20] sm:$0xff]  ;;  %v619_v52 = vld [vmem:[#allocation12 + $0x28] sm:$0xff]  ;;  %v890_v40 = vunpack.c.l.s4 %v3138_v39 }
  0xa8   : > { %2676 = vmatpush3.bf16.msra.mxu0 %v3424_v17  ;;  %2501 = vmatprep.mubr.msk.f32.mxu0 %vm3133_vm1, %v3131_v0  ;;  %v3468_v50 = vpack.c.bf16 %v617_v49, %v616_v48  ;;  %v3474_v53 = vpack.c.bf16 %v619_v52, %v618_v51  ;;  %v620_v54 = vld [vmem:[#allocation12 + $0x30] sm:$0xff]  ;;  %v621_v55 = vld [vmem:[#allocation12 + $0x38] sm:$0xff]  ;;  %v622_v57 = vld [vmem:[#allocation12 + $0x40] sm:$0xff]  ;;  %v859_v41 = vunpack.c.0.s8 %v858_v37  ;;  %p3049_p5 = pneg %p3048_p2 }
  0xa9   : > { %2677 = vmatprep.subr.bf16.mxu0 %v3132_v1  ;;  %2670 = vmatpush3.bf16.msra.mxu1 %v2669_v42  ;;  %v3478_v56 = vpack.c.bf16 %v621_v55, %v620_v54  ;;  %v623_v58 = vld [vmem:[#allocation12 + $0x48] sm:$0xff]  ;;  %v624_v60 = vld [vmem:[#allocation12 + $0x50] sm:$0xff]  ;;  %v625_v61 = vld [vmem:[#allocation12 + $0x58] sm:$0xff] }
  0xaa   : > { %2671 = vmatprep.subr.bf16.mxu1 %v3132_v1  ;;  %v3482_v59 = vpack.c.bf16 %v623_v58, %v622_v57  ;;  %v2714_v62 = vpack.c.bf16 %v625_v61, %v624_v60  ;;  %v626_v63 = vld [vmem:[#allocation12 + $0x60] sm:$0xff]  ;;  %v627_v2 = vld [vmem:[#allocation12 + $0x68] sm:$0xff]  ;;  %v628_v4 = vld [vmem:[#allocation12 + $0x70] sm:$0xff]  ;;  %v3547_v45 = vsub.s32 %v859_v41, %v3490_v8 }
  0xab   : > { %v2717_v3 = vpack.c.bf16 %v627_v2, %v626_v63  ;;  %v629_v5 = vld [vmem:[#allocation12 + $0x78] sm:$0xff]  ;;  %v3496_v10 = vld [vmem:[%s3742_s2] sm:$0x7] }
  0xac   : > { %2679 = vmatpush3.bf16.msra.mxu0 %v3429_v20  ;;  %v2720_v6 = vpack.c.bf16 %v629_v5, %v628_v4  ;;  %v370_v11 = vrot.slane %v3496_v10, %v369_v9 }
  0xad   : > { %2680 = vmatprep.subr.bf16.mxu0 %v3132_v1  ;;  %2673 = vmatpush3.bf16.msra.mxu1 %v2672_v44  ;;  %v891_v44 = vunpack.c.0.s8 %v890_v40 }
  0xae   : > { %2698 = vmatprep.subr.bf16.mxu1 %v3132_v1 }
  0xaf   : > { %v3550_v52 = vsub.s32 %v891_v44, %v3490_v8 }
  0xb0   : > { %2682 = vmatpush3.bf16.msra.mxu0 %v3433_v23  ;;  %2467 = vmatmul.mubr.msk.f32.vlgmr.msra.gmra.mrb[0].mxu1 %vm382_vm0, %v352_v16  ;;  %v373_v16 = vsub.s32 1, %v3490_v8 }
  0xb1   : > { %2683 = vmatprep.subr.bf16.mxu0 %v3132_v1  ;;  %2700 = vmatpush3.bf16.msra.mxu1 %v3463_v47 }
  0xb2   : > { %2536 = vmatprep.mubr.msk.f32.mxu1 %vm3133_vm1, %v3131_v0  ;;  %2701 = vmatprep.subr.bf16.mxu1 %v3132_v1 }
  0xb4   : > { %2685 = vmatpush3.bf16.msra.mxu0 %v3437_v26 }
  0xb5   : > { %2686 = vmatprep.subr.bf16.mxu0 %v3132_v1  ;;  %2703 = vmatpush3.bf16.msra.mxu1 %v3468_v50 }
  0xb6   : > { %2704 = vmatprep.subr.bf16.mxu1 %v3132_v1 }
  0xb8   : > { %2688 = vmatpush3.bf16.msra.mxu0 %v3441_v29 }
  0xb9   : > { %2689 = vmatprep.subr.bf16.mxu0 %v3132_v1  ;;  %2706 = vmatpush3.bf16.msra.mxu1 %v3474_v53 }
  0xba   : > { %2707 = vmatprep.subr.bf16.mxu1 %v3132_v1 }
  0xbc   : > { %2691 = vmatpush3.bf16.msra.mxu0 %v3445_v32 }
  0xbd   : > { %2692 = vmatprep.subr.bf16.mxu0 %v3132_v1  ;;  %2709 = vmatpush3.bf16.msra.mxu1 %v3478_v56 }
  0xbe   : > { %2710 = vmatprep.subr.bf16.mxu1 %v3132_v1 }
  0xc0   : > { %2694 = vmatpush3.bf16.msra.mxu0 %v3449_v35 }
  0xc1   : > { %2695 = vmatprep.subr.bf16.mxu0 %v3132_v1  ;;  %2712 = vmatpush3.bf16.msra.mxu1 %v3482_v59 }
  0xc2   : > { %2713 = vmatprep.subr.bf16.mxu1 %v3132_v1 }
  0xc4   : > { %2697 = vmatpush3.bf16.msra.mxu0 %v3454_v38 }
  0xc5   : > { %2722 = vmatprep.subr.bf16.mxu0 %v3132_v1  ;;  %2715 = vmatpush3.bf16.msra.mxu1 %v2714_v62 }
  0xc6   : > { %2716 = vmatprep.subr.bf16.mxu1 %v3132_v1 }
  0xc9   : > { %2718 = vmatpush3.bf16.msra.mxu1 %v2717_v3 }
  0xca   : > { %2719 = vmatprep.subr.bf16.mxu1 %v3132_v1 }
  0xcd   : > { %2721 = vmatpush3.bf16.msra.mxu1 %v2720_v6 }
  0xce   : > { %2746 = vmatprep.subr.bf16.mxu1 %v3132_v1 }
 0x17a   : > { %v452_v12 = vpop.f32.mrb[0].mxu0 }
 0x17b   : > { %v453_v13 = vadd.f32 %v452_v12, %v370_v11  ;;  %v454_v14 = vpop.f32.mrb[1].mxu0 }
 0x17d   : > { %v527_v15 = vmul.f32 %v453_v13, %v453_v13 }
 0x17f   : > { %2502 = vmatmul.mubr.f32.vlgmr.msra.gmra.mrb[2].mxu0 %v527_v15 }
 0x180   : > { %2724 = vmatpush3.bf16.msra.mxu0 %v3424_v17  ;;  %2571 = vmatprep.mubr.msk.f32.mxu0 %vm3133_vm1, %v3131_v0  ;;  %v374_v17 = vrot.slane %v3496_v10, %v373_v16 }
 0x181   : > { %2725 = vmatprep.subr.bf16.mxu0 %v3132_v1 }
 0x182   : > { %v455_v18 = vadd.f32 %v454_v14, %v374_v17 }
 0x184   : > { %2727 = vmatpush3.bf16.msra.mxu0 %v3429_v20  ;;  %v702_v19 = vmul.f32 %v455_v18, %v455_v18  ;;  %v3521_v20 = vpop.f32.mrb[0].mxu1 }
 0x185   : > { %2728 = vmatprep.subr.bf16.mxu0 %v3132_v1  ;;  %v2468_v21 = vpop.f32.mrb[1].mxu1 }
 0x188   : > { %2730 = vmatpush3.bf16.msra.mxu0 %v3433_v23 }
 0x189   : > { %2731 = vmatprep.subr.bf16.mxu0 %v3132_v1 }
 0x18c   : > { %2733 = vmatpush3.bf16.msra.mxu0 %v3437_v26 }
 0x18d   : > { %2734 = vmatprep.subr.bf16.mxu0 %v3132_v1 }
 0x190   : > { %2736 = vmatpush3.bf16.msra.mxu0 %v3441_v29 }
 0x191   : > { %2737 = vmatprep.subr.bf16.mxu0 %v3132_v1 }
 0x194   : > { %2739 = vmatpush3.bf16.msra.mxu0 %v3445_v32 }
 0x195   : > { %2740 = vmatprep.subr.bf16.mxu0 %v3132_v1 }
 0x198   : > { %2742 = vmatpush3.bf16.msra.mxu0 %v3449_v35 }
 0x199   : > { %2743 = vmatprep.subr.bf16.mxu0 %v3132_v1 }
 0x19c   : > { %2745 = vmatpush3.bf16.msra.mxu0 %v3454_v38 }
 0x19d   : > { %2619 = vmatprep.subr.mxu0 %v3131_v0 }
 0x19f   : > { %2572 = vmatmul.mubr.f32.vlgmr.msra.gmra.mrb[4].mxu0 %v702_v19 }
 0x1a0   : > { %2621 = vmatprep.mubr.msk.f32.mxu0 %vm3133_vm1, %v3131_v0 }
 0x252   : > { %v610_v22 = vpop.f32.mrb[2].mxu0 }
 0x253   : > { %v2503_v23 = vpop.f32.mrb[3].mxu0  ;;  %2537 = vmatmul.mubr.f32.vlgmr.msra.gmra.mrb[2].mxu1 %v610_v22 }
 0x254   : > { %2748 = vmatpush3.bf16.msra.mxu1 %v3463_v47  ;;  %2606 = vmatprep.mubr.msk.f32.mxu1 %vm3133_vm1, %v3131_v0 }
 0x255   : > { %2749 = vmatprep.subr.bf16.mxu1 %v3132_v1 }
 0x258   : > { %2751 = vmatpush3.bf16.msra.mxu1 %v3468_v50 }
 0x259   : > { %2752 = vmatprep.subr.bf16.mxu1 %v3132_v1 }
 0x25c   : > { %2754 = vmatpush3.bf16.msra.mxu1 %v3474_v53 }
 0x25d   : > { %2755 = vmatprep.subr.bf16.mxu1 %v3132_v1 }
 0x260   : > { %2757 = vmatpush3.bf16.msra.mxu1 %v3478_v56 }
 0x261   : > { %2758 = vmatprep.subr.bf16.mxu1 %v3132_v1 }
 0x264   : > { %2760 = vmatpush3.bf16.msra.mxu1 %v3482_v59 }
 0x265   : > { %2761 = vmatprep.subr.bf16.mxu1 %v3132_v1 }
 0x268   : > { %2763 = vmatpush3.bf16.msra.mxu1 %v2714_v62 }
 0x269   : > { %2764 = vmatprep.subr.bf16.mxu1 %v3132_v1 }
 0x26c   : > { %2766 = vmatpush3.bf16.msra.mxu1 %v2717_v3 }
 0x26d   : > { %2767 = vmatprep.subr.bf16.mxu1 %v3132_v1 }
 0x270   : > { %2769 = vmatpush3.bf16.msra.mxu1 %v2720_v6 }
 0x271   : > { %2609 = vmatprep.subr.mxu1 %v3131_v0 }
 0x272   : > { %v769_v24 = vpop.f32.mrb[4].mxu0 }
 0x273   : > { %v2573_v25 = vpop.f32.mrb[5].mxu0  ;;  %2607 = vmatmul.mubr.f32.vlgmr.msra.gmra.mrb[4].mxu1 %v769_v24 }
 0x274   : > { %2611 = vmatprep.mubr.msk.f32.mxu1 %vm3133_vm1, %v3131_v0 }
 0x326   : > { %v696_v26 = vpop.f32.mrb[2].mxu1 }
 0x327   : > { %v697_v27 = vadd.f32 1e-12, %v696_v26  ;;  %v2538_v28 = vpop.f32.mrb[3].mxu1 }
 0x329   : > { %2884 = vrsqrt.f32 %v697_v27 }
 0x333   : > { %v2885_v29 = vpop.eup %2884 }
 0x334   : > { %v701_v30 = vmul.f32 %v2885_v29, %v453_v13 }
 0x336   : > { %846 = vrot.lane.b32.xlu1 %v701_v30, %s3134_s13 }
 0x346   : > { %v839_v31 = vpop.f32.mrb[4].mxu1 }
 0x347   : > { %v840_v32 = vadd.f32 1e-12, %v839_v31  ;;  %v2608_v33 = vpop.f32.mrb[5].mxu1 }
 0x349   : > { %2886 = vrsqrt.f32 %v840_v32 }
 0x353   : > { %v2887_v34 = vpop.eup %2886 }
 0x354   : > { %v844_v35 = vmul.f32 %v2887_v34, %v455_v18 }
 0x356   : > { %1003 = vrot.lane.b32.xlu1 %v844_v35, %s3135_s11  ;;  %997 = vrot.lane.b32.xlu0 %v844_v35, %s3134_s13 }
 0x35a   : > { %852 = vrot.lane.b32.xlu1 %v701_v30, %s3135_s11  ;;  %1000 = vrot.lane.b32.xlu0 %v844_v35, %s3136_s9 }
 0x35e   : > { %849 = vrot.lane.b32.xlu0 %v701_v30, %s3136_s9 }
 0x3a8   : > { %v847_v38 = vpop.permute.xlu1 %846 }
 0x3c8   : > { %v1004_v42 = vpop.permute.xlu1 %1003  ;;  %v998_v43 = vpop.permute.xlu0 %997 }
 0x3c9   : > { %v1022_v46 = vcombine.low %v998_v43, %v1004_v42  ;;  %v1023_v47 = vcombine.high %v998_v43, %v1004_v42 }
 0x3cb   : > { %v1030_v53 = vrot.slane %v1022_v46, %v3547_v45  ;;  %v1037_v54 = vrot.slane %v1023_v47, %v3547_v45 }
 0x3cc   : > { %v1001_v48 = vpop.permute.xlu0 %1000  ;;  %v853_v49 = vpop.permute.xlu1 %852 }
 0x3cd   : > { %v1006_v50 = vcombine.low %v844_v35, %v1001_v48  ;;  %v1007_v51 = vcombine.high %v844_v35, %v1001_v48  ;;  %v871_v57 = vcombine.low %v847_v38, %v853_v49  ;;  %v872_v58 = vcombine.high %v847_v38, %v853_v49 }
 0x3cf   : > { %v1014_v55 = vrot.slane %v1006_v50, %v3547_v45  ;;  %v1021_v56 = vrot.slane %v1007_v51, %v3547_v45  ;;  %v879_v9 = vrot.slane %v871_v57, %v3547_v45  ;;  %v886_v11 = vrot.slane %v872_v58, %v3547_v45 }
 0x3d0   : > { %v850_v59 = vpop.permute.xlu0 %849 }
 0x3d1   : > { %v1038_v60 = vcombine.low %v1014_v55, %v1030_v53  ;;  %v1039_v61 = vcombine.high %v1014_v55, %v1030_v53  ;;  %v1054_v62 = vcombine.low %v1021_v56, %v1037_v54  ;;  %v1055_v63 = vcombine.high %v1021_v56, %v1037_v54 }
 0x3d2   : > { %v855_v2 = vcombine.low %v701_v30, %v850_v59  ;;  %v856_v3 = vcombine.high %v701_v30, %v850_v59 }
 0x3d3   : > { %v1046_v4 = vrot.slane %v1038_v60, %v3550_v52  ;;  %v1053_v5 = vrot.slane %v1039_v61, %v3550_v52  ;;  %v1062_v6 = vrot.slane %v1054_v62, %v3550_v52  ;;  %v1069_v7 = vrot.slane %v1055_v63, %v3550_v52 }
 0x3d4   : > { %v863_v12 = vrot.slane %v855_v2, %v3547_v45  ;;  %v870_v13 = vrot.slane %v856_v3, %v3547_v45 }
 0x3d5   : > { %v1074_v14 = vcombine.low %v1046_v4, %v1053_v5  ;;  %v2340_v15 = vcombine.high %v1046_v4, %v1053_v5  ;;  %v1090_v16 = vcombine.low %v1062_v6, %v1069_v7  ;;  %v2341_v17 = vcombine.high %v1062_v6, %v1069_v7 }
 0x3d6   : > { %v887_v18 = vcombine.low %v863_v12, %v879_v9  ;;  %v888_v19 = vcombine.high %v863_v12, %v879_v9  ;;  %v903_v21 = vcombine.low %v870_v13, %v886_v11  ;;  %v904_v22 = vcombine.high %v870_v13, %v886_v11 }
 0x3d7   : > { %v1081_v23 = vrot.slane %v1074_v14, %v3547_v45  ;;  %v1089_v24 = vrot.slane %v2340_v15, %v3547_v45  ;;  %v1097_v25 = vrot.slane %v1090_v16, %v3547_v45  ;;  %v1105_v26 = vrot.slane %v2341_v17, %v3547_v45 }
 0x3d8   : > { %v895_v27 = vrot.slane %v887_v18, %v3550_v52  ;;  %v902_v28 = vrot.slane %v888_v19, %v3550_v52  ;;  %v911_v29 = vrot.slane %v903_v21, %v3550_v52  ;;  %v918_v30 = vrot.slane %v904_v22, %v3550_v52 }
 0x3d9   : > { %v1106_v31 = vcombine.low %v1081_v23, %v1089_v24  ;;  %v1107_v32 = vcombine.high %v1081_v23, %v1089_v24  ;;  %v1122_v33 = vcombine.low %v1097_v25, %v1105_v26  ;;  %v1123_v34 = vcombine.high %v1097_v25, %v1105_v26 }
 0x3da   : > { %v923_v35 = vcombine.low %v895_v27, %v902_v28  ;;  %v2338_v36 = vcombine.high %v895_v27, %v902_v28  ;;  %v939_v37 = vcombine.low %v911_v29, %v918_v30  ;;  %v2339_v38 = vcombine.high %v911_v29, %v918_v30 }
 0x3db   : > { %v1114_v39 = vrot.slane %v1106_v31, %v3550_v52  ;;  %v1121_v40 = vrot.slane %v1107_v32, %v3550_v52  ;;  %v1130_v41 = vrot.slane %v1122_v33, %v3550_v52  ;;  %v1137_v42 = vrot.slane %v1123_v34, %v3550_v52 }
 0x3dc   : > { %v930_v43 = vrot.slane %v923_v35, %v3547_v45  ;;  %v938_v44 = vrot.slane %v2338_v36, %v3547_v45  ;;  %v946_v46 = vrot.slane %v939_v37, %v3547_v45  ;;  %v954_v47 = vrot.slane %v2339_v38, %v3547_v45 }
 0x3dd   : > { %v1138_v48 = vcombine.low %v1114_v39, %v1130_v41  ;;  %v1139_v49 = vcombine.high %v1114_v39, %v1130_v41  ;;  %v1140_v50 = vcombine.low %v1121_v40, %v1137_v42  ;;  %v1141_v51 = vcombine.high %v1121_v40, %v1137_v42 }
 0x3de   : > { %v955_v53 = vcombine.low %v930_v43, %v938_v44  ;;  %v956_v54 = vcombine.high %v930_v43, %v938_v44  ;;  %v971_v55 = vcombine.low %v946_v46, %v954_v47  ;;  %v972_v56 = vcombine.high %v946_v46, %v954_v47 }
 0x3df   : > { %1142 = vst.msk [vmem:[#allocation3] sm:$0xff] %vm991_vm2, %v1138_v48  ;;  %1143 = vst.msk [vmem:[#allocation3 + $0x8] sm:$0xff] %vm991_vm2, %v1139_v49  ;;  %v377_v30 = vsub.s32 2, %v3490_v8 }
 0x3e0   : > { %1144 = vst.msk [vmem:[#allocation3 + $0x10] sm:$0xff] %vm991_vm2, %v1140_v50  ;;  %1145 = vst.msk [vmem:[#allocation3 + $0x18] sm:$0xff] %vm991_vm2, %v1141_v51  ;;  %v963_v57 = vrot.slane %v955_v53, %v3550_v52  ;;  %v970_v58 = vrot.slane %v956_v54, %v3550_v52  ;;  %v979_v59 = vrot.slane %v971_v55, %v3550_v52 }
 0x3e1   : > { %v986_v60 = vrot.slane %v972_v56, %v3550_v52  ;;  %v378_v31 = vrot.slane %v3496_v10, %v377_v30 }
 0x3e2   : > { %v987_v61 = vcombine.low %v963_v57, %v979_v59  ;;  %v988_v62 = vcombine.high %v963_v57, %v979_v59 }
 0x3e3   : > { %v989_v63 = vcombine.low %v970_v58, %v986_v60  ;;  %v990_v2 = vcombine.high %v970_v58, %v986_v60  ;;  %v524_v32 = vadd.f32 %v3521_v20, %v378_v31 }
 0x3e4   : > { %992 = vst.msk [vmem:[#allocation2] sm:$0xff] %vm991_vm2, %v987_v61  ;;  %993 = vst.msk [vmem:[#allocation2 + $0x8] sm:$0xff] %vm991_vm2, %v988_v62 }
 0x3e5   : > { %994 = vst.msk [vmem:[#allocation2 + $0x10] sm:$0xff] %vm991_vm2, %v989_v63  ;;  %995 = vst.msk [vmem:[#allocation2 + $0x18] sm:$0xff] %vm991_vm2, %v990_v2 }
 0x3e6   : > { %v1300_v3 = vld [vmem:[#allocation3] sm:$0xff]  ;;  %v1301_v7 = vld [vmem:[#allocation3 + $0x8] sm:$0xff] }
 0x3e7   : > { %v1302_v4 = vld [vmem:[#allocation3 + $0x10] sm:$0xff]  ;;  %2610 = vmatpush3.xpose.msk.msra.mxu1 %vm991_vm2, %v1300_v3  ;;  %v1303_v11 = vld [vmem:[#allocation3 + $0x18] sm:$0xff] }
 0x3e8   : > { %2620 = vmatpush3.xpose.msk.msra.mxu0 %vm991_vm2, %v1302_v4  ;;  %2614 = vmatprep.subr.mxu1 %v3131_v0 }
 0x3e9   : > { %2629 = vmatprep.subr.mxu0 %v3131_v0 }
 0x3eb   : > { %v1296_v5 = vld [vmem:[#allocation2] sm:$0xff]  ;;  %v1297_v9 = vld [vmem:[#allocation2 + $0x8] sm:$0xff] }
 0x3ec   : > { %v1298_v6 = vld [vmem:[#allocation2 + $0x10] sm:$0xff]  ;;  %2612 = vmatmul.mubr.msk.f32.vlgmr.msra.gmra.mrb[6].mxu1 %vm991_vm2, %v1296_v5  ;;  %v1299_v12 = vld [vmem:[#allocation2 + $0x18] sm:$0xff] }
 0x3ed   : > { %2622 = vmatmul.mubr.msk.f32.vlgmr.msra.gmra.mrb[6].mxu0 %vm991_vm2, %v1298_v6  ;;  %2615 = vmatpush3.xpose.msk.msra.mxu1 %vm991_vm2, %v1301_v7 }
 0x3ee   : > { %2616 = vmatprep.mubr.msk.f32.mxu1 %vm3133_vm1, %v3131_v0  ;;  %2624 = vmatprep.subr.mxu1 %v3131_v0 }
 0x3ef   : > { %2631 = vmatprep.mubr.msk.f32.mxu0 %vm3133_vm1, %v3131_v0 }
 0x3f0   : > { %2617 = vmatmul.mubr.msk.f32.vlgmr.msra.gmra.mrb[8].mxu1 %vm991_vm2, %v1297_v9 }
 0x3f1   : > { %2625 = vmatpush3.xpose.msk.msra.mxu1 %vm991_vm2, %v1303_v11  ;;  %2626 = vmatprep.mubr.msk.f32.mxu1 %vm3133_vm1, %v3131_v0 }
 0x3f2   : > { %2634 = vmatprep.subr.mxu1 %v3131_v0 }
 0x3f4   : > { %2627 = vmatmul.mubr.msk.f32.vlgmr.msra.gmra.mrb[10].mxu1 %vm991_vm2, %v1299_v12 }
 0x3f5   : > { %2636 = vmatprep.mubr.msk.f32.mxu1 %vm3133_vm1, %v3131_v0 }
 0x4bf   : > { %v1380_v13 = vpop.f32.mrb[6].mxu1 }
 0x4c0   : > { %v1532_v14 = vpop.f32.mrb[6].mxu0  ;;  %v1612_v15 = vmul.f32 0.35355338, %v1380_v13  ;;  %v2613_v16 = vpop.f32.mrb[7].mxu1 }
 0x4c1   : > { %v2623_v17 = vpop.f32.mrb[7].mxu0  ;;  %v1614_v18 = vmul.f32 0.35355338, %v1532_v14 }
 0x4c2   : > { %v1616_v19 = vsel %vm991_vm2, %v1612_v15, -inf }
 0x4c3   : > { %1617 = vmax.xlane.f32.xlu0 %v1616_v19  ;;  %v1456_v21 = vpop.f32.mrb[8].mxu1  ;;  %v1622_v25 = vsel %vm991_vm2, %v1614_v18, -inf }
 0x4c4   : > { %v1613_v22 = vmul.f32 0.35355338, %v1456_v21  ;;  %v2618_v23 = vpop.f32.mrb[9].mxu1 }
 0x4c6   : > { %v1619_v24 = vsel %vm991_vm2, %v1613_v22, -inf }
 0x4c7   : > { %1620 = vmax.xlane.f32.xlu1 %v1619_v24  ;;  %v1608_v26 = vpop.f32.mrb[10].mxu1  ;;  %1623 = vmax.xlane.f32.xlu0 %v1622_v25 }
 0x4c8   : > { %v1615_v27 = vmul.f32 0.35355338, %v1608_v26  ;;  %v2628_v28 = vpop.f32.mrb[11].mxu1 }
 0x4ca   : > { %v1625_v29 = vsel %vm991_vm2, %v1615_v27, -inf }
 0x4cb   : > { %1626 = vmax.xlane.f32.xlu0 %v1625_v29 }
 0x4d8   : > { %1147 = vrot.lane.b32.xlu1 %v524_v32, %s3134_s13 }
 0x4dc   : > { %1153 = vrot.lane.b32.xlu1 %v524_v32, %s3135_s11  ;;  %s3695_s11 = scalar_lea.hbm %s3747_s7, %s2361_s14 }
 0x4e1   : > { %1150 = vrot.lane.b32.xlu0 %v524_v32, %s3136_s9  ;;  %s2199_s9 = scalar_lea.sflag [#allocation8], %s3404_s28 }
 0x550   : > { %v1618_v33 = vpop.xlane.xlu0 %1617 }
 0x551   : > { %v1628_v34 = vsub.f32 %v1612_v15, %v1618_v33 }
 0x553   : > { %v1632_v35 = vmul.f32 1.442695, %v1628_v34 }
 0x554   : > { %v1621_v36 = vpop.xlane.xlu1 %1620  ;;  %v1624_v37 = vpop.xlane.xlu0 %1623 }
 0x555   : > { %2888 = vpow2.f32 %v1632_v35  ;;  %v1629_v38 = vsub.f32 %v1613_v22, %v1621_v36  ;;  %v1630_v39 = vsub.f32 %v1614_v18, %v1624_v37 }
 0x557   : > { %v1634_v40 = vmul.f32 1.442695, %v1629_v38  ;;  %v1636_v8 = vmul.f32 1.442695, %v1630_v39 }
 0x558   : > { %v1148_v41 = vpop.permute.xlu1 %1147  ;;  %v1627_v10 = vpop.xlane.xlu0 %1626 }
 0x559   : > { %2890 = vpow2.f32 %v1634_v40  ;;  %v1631_v20 = vsub.f32 %v1615_v27, %v1627_v10 }
 0x55a   : > { %2892 = vpow2.f32 %v1636_v8 }
 0x55b   : > { %v1638_v42 = vmul.f32 1.442695, %v1631_v20 }
 0x55c   : > { %v1154_v43 = vpop.permute.xlu1 %1153  ;;  %v1151_v44 = vpop.permute.xlu0 %1150 }
 0x55d   : > { %2894 = vpow2.f32 %v1638_v42  ;;  %v1172_v46 = vcombine.low %v1148_v41, %v1154_v43  ;;  %v1173_v47 = vcombine.high %v1148_v41, %v1154_v43  ;;  %v1156_v48 = vcombine.low %v524_v32, %v1151_v44 }
 0x55e   : > { %v1157_v49 = vcombine.high %v524_v32, %v1151_v44 }
 0x55f   : > { %v3622_v50 = vpop.eup %2888  ;;  %v1180_v51 = vrot.slane %v1172_v46, %v3547_v45  ;;  %v1187_v53 = vrot.slane %v1173_v47, %v3547_v45  ;;  %v1164_v54 = vrot.slane %v1156_v48, %v3547_v45  ;;  %v2113_v46 = vld [vmem:[#allocation14] sm:$0xff]  ;;  %v2114_v47 = vld [vmem:[#allocation14 + $0x8] sm:$0xff] }
 0x560   : > { %v1171_v55 = vrot.slane %v1157_v49, %v3547_v45  ;;  %v1640_v56 = vsel %vm991_vm2, %v3622_v50, 0.0  ;;  %v2771_v48 = vpack.c.bf16 %v2114_v47, %v2113_v46 }
 0x561   : > { %v1188_v57 = vcombine.low %v1164_v54, %v1180_v51  ;;  %v1189_v58 = vcombine.high %v1164_v54, %v1180_v51  ;;  %1641 = vadd.xlane.f32.xlu1 %v1640_v56 }
 0x562   : > { %v1204_v59 = vcombine.low %v1171_v55, %v1187_v53  ;;  %v1205_v60 = vcombine.high %v1171_v55, %v1187_v53 }
 0x563   : > { %v2891_v61 = vpop.eup %2890  ;;  %v1196_v62 = vrot.slane %v1188_v57, %v3550_v52  ;;  %v1203_v63 = vrot.slane %v1189_v58, %v3550_v52 }
 0x564   : > { %v1212_v2 = vrot.slane %v1204_v59, %v3550_v52  ;;  %v1219_v3 = vrot.slane %v1205_v60, %v3550_v52  ;;  %v1643_v4 = vsel %vm991_vm2, %v2891_v61, 0.0  ;;  %v2893_v5 = vpop.eup %2892 }
 0x565   : > { %v1224_v6 = vcombine.low %v1196_v62, %v1203_v63  ;;  %v2342_v7 = vcombine.high %v1196_v62, %v1203_v63  ;;  %1644 = vadd.xlane.f32.xlu0 %v1643_v4  ;;  %v1646_v17 = vsel %vm991_vm2, %v2893_v5, 0.0 }
 0x566   : > { %v1240_v9 = vcombine.low %v1212_v2, %v1219_v3  ;;  %v2343_v11 = vcombine.high %v1212_v2, %v1219_v3 }
 0x567   : > { %v2895_v12 = vpop.eup %2894  ;;  %v1231_v13 = vrot.slane %v1224_v6, %v3547_v45  ;;  %v1239_v14 = vrot.slane %v2342_v7, %v3547_v45  ;;  %v2115_v6 = vld [vmem:[#allocation14 + $0x10] sm:$0xff]  ;;  %v2116_v7 = vld [vmem:[#allocation14 + $0x18] sm:$0xff] }
 0x568   : > { %v1247_v15 = vrot.slane %v1240_v9, %v3547_v45  ;;  %v1255_v16 = vrot.slane %v2343_v11, %v3547_v45  ;;  %v1649_v18 = vsel %vm991_vm2, %v2895_v12, 0.0 }
 0x569   : > { %v1256_v19 = vcombine.low %v1231_v13, %v1239_v14  ;;  %v1257_v21 = vcombine.high %v1231_v13, %v1239_v14  ;;  %1647 = vadd.xlane.f32.xlu0 %v1646_v17  ;;  %1650 = vadd.xlane.f32.xlu1 %v1649_v18  ;;  %v2774_v14 = vpack.c.bf16 %v2116_v7, %v2115_v6 }
 0x56a   : > { %v1272_v22 = vcombine.low %v1247_v15, %v1255_v16  ;;  %v1273_v23 = vcombine.high %v1247_v15, %v1255_v16 }
 0x56b   : > { %v1264_v24 = vrot.slane %v1256_v19, %v3550_v52  ;;  %v1271_v25 = vrot.slane %v1257_v21, %v3550_v52 }
 0x56c   : > { %v1280_v26 = vrot.slane %v1272_v22, %v3550_v52  ;;  %v1287_v27 = vrot.slane %v1273_v23, %v3550_v52 }
 0x56e   : > { %v1288_v28 = vcombine.low %v1264_v24, %v1280_v26  ;;  %v1289_v29 = vcombine.high %v1264_v24, %v1280_v26  ;;  %v1290_v30 = vcombine.low %v1271_v25, %v1287_v27  ;;  %v1291_v31 = vcombine.high %v1271_v25, %v1287_v27 }
 0x570   : > { %1292 = vst.msk [vmem:[#allocation4] sm:$0xff] %vm991_vm2, %v1288_v28  ;;  %1293 = vst.msk [vmem:[#allocation4 + $0x8] sm:$0xff] %vm991_vm2, %v1289_v29 }
 0x571   : > { %1294 = vst.msk [vmem:[#allocation4 + $0x10] sm:$0xff] %vm991_vm2, %v1290_v30  ;;  %1295 = vst.msk [vmem:[#allocation4 + $0x18] sm:$0xff] %vm991_vm2, %v1291_v31 }
 0x577   : > { %v1304_v32 = vld [vmem:[#allocation4] sm:$0xff]  ;;  %v1305_v33 = vld [vmem:[#allocation4 + $0x8] sm:$0xff] }
 0x578   : > { %2630 = vmatpush3.msra.mxu0 %v1304_v32  ;;  %2635 = vmatpush3.msra.mxu1 %v1305_v33  ;;  %v1306_v40 = vld [vmem:[#allocation4 + $0x10] sm:$0xff]  ;;  %v1307_v10 = vld [vmem:[#allocation4 + $0x18] sm:$0xff] }
 0x579   : > { %2639 = vmatprep.subr.mxu0 %v3131_v0  ;;  %2644 = vmatprep.subr.mxu1 %v3131_v0 }
 0x5ee   : > { %v1642_v34 = vpop.xlane.xlu1 %1641 }
 0x5ef   : > { %2896 = vrcp.f32 %v1642_v34 }
 0x5f2   : > { %v1645_v35 = vpop.xlane.xlu0 %1644 }
 0x5f3   : > { %2898 = vrcp.f32 %v1645_v35 }
 0x5f6   : > { %v1651_v36 = vpop.xlane.xlu1 %1650  ;;  %v1648_v37 = vpop.xlane.xlu0 %1647 }
 0x5f7   : > { %2900 = vrcp.f32 %v1651_v36 }
 0x5f8   : > { %2902 = vrcp.f32 %v1648_v37 }
 0x5f9   : > { %v2897_v38 = vpop.eup %2896 }
 0x5fa   : > { %v1656_v39 = vmul.f32 %v2897_v38, %v3622_v50 }
 0x5fc   : > { %2632 = vmatmul.mubr.msk.f32.vlgmr.msra.gmra.mrb[8].mxu0 %vm991_vm2, %v1656_v39 }
 0x5fd   : > { %v2899_v8 = vpop.eup %2898  ;;  %2640 = vmatpush3.msra.mxu0 %v1306_v40  ;;  %2641 = vmatprep.mubr.msk.f32.mxu0 %vm3133_vm1, %v3131_v0  ;;  %v2358_v40 = vld [vmem:[%s3746_s6] ss:$0 sm:$0xff] }
 0x5fe   : > { %v1657_v41 = vmul.f32 %v2899_v8, %v2891_v61  ;;  %2770 = vmatprep.subr.bf16.mxu0 %v3132_v1 }
 0x600   : > { %2637 = vmatmul.mubr.msk.f32.vlgmr.msra.gmra.mrb[12].mxu1 %vm991_vm2, %v1657_v41 }
 0x601   : > { %v2901_v20 = vpop.eup %2900  ;;  %2645 = vmatpush3.msra.mxu1 %v1307_v10  ;;  %2646 = vmatprep.mubr.msk.f32.mxu1 %vm3133_vm1, %v3131_v0 }
 0x602   : > { %v2903_v42 = vpop.eup %2902  ;;  %v1659_v43 = vmul.f32 %v2901_v20, %v2895_v12 }
 0x603   : > { %v1658_v44 = vmul.f32 %v2903_v42, %v2893_v5 }
 0x604   : > { %2647 = vmatmul.mubr.msk.f32.vlgmr.msra.gmra.mrb[14].mxu1 %vm991_vm2, %v1659_v43 }
 0x605   : > { %2642 = vmatmul.mubr.msk.f32.vlgmr.msra.gmra.mrb[10].mxu0 %vm991_vm2, %v1658_v44 }
 0x606   : > { %2657 = vmatprep.mubr.msk.f32.mxu0 %vm3133_vm1, %v3131_v0  ;;  %2772 = vmatpush3.bf16.msra.mxu0 %v2771_v48 }
 0x607   : > { %2773 = vmatprep.subr.bf16.mxu0 %v3132_v1 }
 0x60a   : > { %2775 = vmatpush3.bf16.msra.mxu0 %v2774_v14 }
 0x6cf   : > { %v1729_v49 = vpop.f32.mrb[8].mxu0 }
 0x6d0   : > { %1952 = vst.msk [vmem:[#allocation5] sm:$0xff] %vm991_vm2, %v1729_v49  ;;  %v2633_v50 = vpop.f32.mrb[9].mxu0 }
 0x6d3   : > { %v1802_v51 = vpop.f32.mrb[12].mxu1 }
 0x6d4   : > { %1953 = vst.msk [vmem:[#allocation5 + $0x8] sm:$0xff] %vm991_vm2, %v1802_v51  ;;  %v2638_v53 = vpop.f32.mrb[13].mxu1 }
 0x6d7   : > { %v1948_v54 = vpop.f32.mrb[14].mxu1 }
 0x6d8   : > { %v1875_v55 = vpop.f32.mrb[10].mxu0  ;;  %1955 = vst.msk [vmem:[#allocation5 + $0x18] sm:$0xff] %vm991_vm2, %v1948_v54  ;;  %v2648_v56 = vpop.f32.mrb[15].mxu1 }
 0x6d9   : > { %1954 = vst.msk [vmem:[#allocation5 + $0x10] sm:$0xff] %vm991_vm2, %v1875_v55  ;;  %v2643_v0 = vpop.f32.mrb[11].mxu0 }
 0x6df   : > { %v2881_v57 = vld [vmem:[#allocation5 + $0x8] ss:$16 sps:$4 sm:$0xff]   ;;  %v2883_v58 = vld [vmem:[#allocation5 + $0xc] ss:$16 sps:$4 sm:$0xff]  }
 0x6e0   : > { %v2878_v59 = vld [vmem:[#allocation5] ss:$16 sps:$4 sm:$0xff]   ;;  %v2880_v1 = vld [vmem:[#allocation5 + $0x4] ss:$16 sps:$4 sm:$0xff]   ;;  %v1984_v60 = vrot.slane %v2881_v57, %v3547_v45  ;;  %v1991_v61 = vrot.slane %v2883_v58, %v3547_v45 }
 0x6e1   : > { %v1968_v62 = vrot.slane %v2878_v59, %v3547_v45  ;;  %v1975_v63 = vrot.slane %v2880_v1, %v3547_v45 }
 0x6e3   : > { %v1992_v2 = vcombine.low %v1968_v62, %v1984_v60  ;;  %v1993_v3 = vcombine.high %v1968_v62, %v1984_v60  ;;  %v2008_v4 = vcombine.low %v1975_v63, %v1991_v61  ;;  %v2009_v5 = vcombine.high %v1975_v63, %v1991_v61 }
 0x6e5   : > { %v2000_v9 = vrot.slane %v1992_v2, %v3550_v52  ;;  %v2007_v11 = vrot.slane %v1993_v3, %v3550_v52  ;;  %v2016_v12 = vrot.slane %v2008_v4, %v3550_v52  ;;  %v2023_v13 = vrot.slane %v2009_v5, %v3550_v52 }
 0x6e7   : > { %v2028_v15 = vcombine.low %v2000_v9, %v2007_v11  ;;  %v2356_v16 = vcombine.high %v2000_v9, %v2007_v11  ;;  %v2044_v17 = vcombine.low %v2016_v12, %v2023_v13  ;;  %v2357_v18 = vcombine.high %v2016_v12, %v2023_v13 }
 0x6e9   : > { %v2035_v19 = vrot.slane %v2028_v15, %v3547_v45  ;;  %v2043_v21 = vrot.slane %v2356_v16, %v3547_v45  ;;  %v2051_v22 = vrot.slane %v2044_v17, %v3547_v45  ;;  %v2059_v23 = vrot.slane %v2357_v18, %v3547_v45 }
 0x6eb   : > { %v2061_v24 = vcombine.high %v2035_v19, %v2043_v21  ;;  %v2077_v25 = vcombine.high %v2051_v22, %v2059_v23  ;;  %v2060_v26 = vcombine.low %v2035_v19, %v2043_v21  ;;  %v2076_v27 = vcombine.low %v2051_v22, %v2059_v23 }
 0x6ed   : > { %v2075_v28 = vrot.slane %v2061_v24, %v3550_v52  ;;  %v2091_v29 = vrot.slane %v2077_v25, %v3550_v52  ;;  %v2068_v30 = vrot.slane %v2060_v26, %v3550_v52  ;;  %v2084_v31 = vrot.slane %v2076_v27, %v3550_v52 }
 0x6ef   : > { %v2094_v32 = vcombine.low %v2075_v28, %v2091_v29  ;;  %v2093_v33 = vcombine.high %v2068_v30, %v2084_v31  ;;  %v2092_v34 = vcombine.low %v2068_v30, %v2084_v31  ;;  %v2095_v45 = vcombine.high %v2075_v28, %v2091_v29 }
 0x6f1   : > { %2101 = vrot.lane.b32.xlu1 %v2094_v32, %s3139_s29  ;;  %2097 = vrot.lane.b32.xlu0 %v2093_v33, %s3140_s23  ;;  %s3050_s29 = sshll.u32 %s3142_s18, 4  ;;  %s3051_s29 = int_to_ptr.vmem [resolvable:$false] %s3050_s29 }
 0x6f2   : > { %s3052_s23 = scalar_lea.vmem %s3051_s29, 256  ;;  %p3053_p10 = scmp.lt.s32.totalorder %s3697_s8, %s3051_s29 }
 0x6f3   : > { %p3054_p1 = scmp.lt.s32.totalorder %s3052_s23, %s3046_s30 }
 0x6f5   : > { %2105 = vrot.lane.b32.xlu1 %v2095_v45, %s3141_s21  ;;  %p3055_p11 = por %p3054_p1, %p3053_p10 }
 0x6f7   : > { %p3056_p12 = pnand %p3055_p11, %p3049_p5 }
 0x763   : > { %v2102_v35 = vpop.permute.xlu1 %2101  ;;  %v2098_v36 = vpop.permute.xlu0 %2097 }
 0x764   : > { %v2108_v37 = vsel %vm991_vm2, %v2092_v34, %v2098_v36 }
 0x765   : > { %v2110_v38 = vsel %vm2109_vm3, %v2108_v37, %v2102_v35 }
 0x767   : > { %v2106_v52 = vpop.permute.xlu1 %2105 }
 0x768   : > { %v2112_v39 = vsel %vm2111_vm4, %v2110_v38, %v2106_v52 }
 0x769   : > { %2658 = vmatmul.mubr.msk.f32.vlgmr.msra.gmra.mrb[12].mxu0 %vm382_vm0, %v2112_v39 }
 0x83c   : > { %v2193_v8 = vpop.f32.mrb[12].mxu0 }
 0x83d   : > { %v2194_v41 = vadd.f32 %v2358_v40, %v2193_v8  ;;  %v2659_v10 = vpop.f32.mrb[13].mxu0 }
 0x83f   : > { %2197 = vst.msk [vmem:[%s351_s20] sm:$0xff] %vm382_vm0, %v2194_v41 }
 0x840   : > { %3059 = shalt.err (!%p3056_p12)
}
 0x841   : > { %s3060_s28 = scalar_lea.hbm %s3695_s11, 128  ;;  %s3064_s17 = scalar_lea.hbm %s3747_s7, 256 }
 0x842   : > { %p3061_p13 = scmp.ne.s32.totalorder %s3695_s11, %s3060_s28  ;;  %p3065_p9 = scmp.lt.u32.totalorder %s3695_s11, %s3747_s7 }
 0x843   : > { %p3066_p4 = scmp.lt.u32.totalorder %s3064_s17, %s3060_s28  ;;  %p3068_p6 = scmp.lt.u32.totalorder %s3060_s28, %s3695_s11 }
 0x844   : > { %p3062_p3 = pnand %p3061_p13, %p3765_p0 }
 0x845   : > { %p3067_p8 = por %p3066_p4, %p3065_p9 }
 0x846   : > { %p3063_p7 = pneg %p3062_p3 }
 0x847   : > { %p3069_p2 = por %p3068_p6, %p3067_p8 }
 0x849   : > { %p3070_p5 = pnand %p3069_p2, %p3063_p7 }
 0x84b   : > { %3073 = shalt.err (!%p3070_p5)
}
 0x84c   : > { %2794 = dma.vmem_to_hbm [thread:$0]  (%p3765_p0), %s3697_s8, 128, %s3695_s11, %s2199_s9  }
 0x84d PF: > { %s2224_s22 = sand.u32 1, %s3108_s24   ;;  %p3766_p10 = scmp.ne.s32.totalorder %s3758_s15, 0 }
 0x84e   : > { %p3767_p1 = scmp.ge.s32.totalorder %s3120_s27, 2  ;;  %s2225_s13 = scalar_lea.sflag [#allocation8], %s2224_s22 }
 0x850   : > { %p2814_p11 = pnand %p3767_p1, %p3766_p10 }
 0x852   : > { %3103 = dma.done.wait (!%p2814_p11), %s2225_s13, 128  }
 0x853   : > { %3105 = vsyncadd (!%p2814_p11), %s2225_s13, 4294967168  ;;  %p22_p12 = scmp.ge.s32.totalorder %s3328_s19, 4   ;;  %s3768_s24 = smov %s3112_s25 }
 0x854   : > { %s3769_s25 = smov %s3116_s26  ;;  %s3770_s26 = smov %s3339_s12 }
 0x855   : > { %s3771_s27 = smov %s3328_s19  ;;  %24 = sbr.rel (!%p22_p12) target bundleno = 7 (0x7), region = 109 }
 0x85c   :  { %2230 = vsyncpa [#allocation7], 1 }
 0x85d   :  { %2232 = vsyncpa [#allocation7 + $0x1], 1 }
 0x85e   :  { %2233 = vsyncpa [#allocation10], 1 }
 0x85f   :  { %2234 = vsyncpa [#allocation13], 1 }
 0x860   :  { %2235 = vsyncpa [#allocation8], 1 }
 0x861   :  { %2237 = vsyncpa [#allocation8 + $0x1], 1 }

</bundles_post_ra>
